<compile_context>
chip_gen: v7x
topology: tpu7x:2x2x1
jax: 0.10.0
libtpu: 0.0.40
codegen_flags: <defaults>
</compile_context>

<pallas_src>
import functools

import numpy as np
import jax
import jax.numpy as jnp
from jax.experimental import pallas as pl
from jax.experimental.pallas import tpu as pltpu

TM = 256        # row tile for the grouped MLP (>=256 for v6e/v7x MXU; use 128 on v5e)
TF_MAX = 512    # max n_inner chunk per grid step (keeps weight blocks small for v7x VMEM)
GATE_TILE = 256  # row tile for the gating matmul


# ----------------------------- gating kernel ------------------------------- #
def _gating_kernel(x_ref, wg_ref, o_ref):
    o_ref[...] = jnp.dot(x_ref[...], wg_ref[...], preferred_element_type=jnp.float32)


def gating_logits(x_flat, wg_t, n_experts, *, tile=GATE_TILE):
    """x_flat: [T, D] bf16, wg_t: [D, E] bf16 -> f32 logits [T, E].

    E is padded to 128 lanes (lane-dense stores), T is tiled, output is f32 so
    softmax/top-k see un-truncated gate values.
    """
    T, D = x_flat.shape
    E = n_experts
    Ep = max(128, ((E + 127) // 128) * 128)
    tm = min(tile, ((T + 7) // 8) * 8)
    Tp = ((T + tm - 1) // tm) * tm
    x_p = jnp.pad(x_flat, ((0, Tp - T), (0, 0)))
    wg_p = jnp.pad(wg_t, ((0, 0), (0, Ep - E)))
    out = pl.pallas_call(
        _gating_kernel,
        out_shape=jax.ShapeDtypeStruct((Tp, Ep), jnp.float32),
        grid=(Tp // tm,),
        in_specs=[
            pl.BlockSpec((tm, D), lambda i: (i, 0)),
            pl.BlockSpec((D, Ep), lambda i: (0, 0)),
        ],
        out_specs=pl.BlockSpec((tm, Ep), lambda i: (i, 0)),
        compiler_params=pltpu.CompilerParams(dimension_semantics=("parallel",)),
    )(x_p, wg_p)
    return out[:T, :E]


# -------------------------- grouped expert MLP ------------------------------ #
def _grouped_mlp_kernel(gids_ref, x_ref, w1_ref, w2_ref, gate_ref, o_ref, acc_ref):
    f = pl.program_id(1)

    @pl.when(f == 0)
    def _():
        acc_ref[...] = jnp.zeros_like(acc_ref)

    # h-chunk = act(x @ w1[:, f_blk]);  y += h-chunk @ w2[f_blk, :]
    # TODO(synk): GroupedMlp internals (incl. the fp8 quantization scheme) are not
    # given; bf16 GEMMs with GELU(tanh) are assumed.  On v7x, fp8 w1/w2 operands
    # could be fed straight to the MXU here with per-expert scales applied after.
    h = jnp.dot(x_ref[...], w1_ref[0], preferred_element_type=jnp.float32)
    h = jax.nn.gelu(h, approximate=True).astype(x_ref.dtype)
    acc_ref[...] += jnp.dot(h, w2_ref[0], preferred_element_type=jnp.float32)

    @pl.when(f == pl.num_programs(1) - 1)
    def _():
        # Fused router-gate multiply at writeback (free VPU work under the MXU).
        o_ref[...] = (acc_ref[...] * gate_ref[...]).astype(o_ref.dtype)


def _pick_inner_tile(F, max_tile=TF_MAX):
    if F <= max_tile:
        return F
    for cand in range(max_tile, 0, -128):
        if F % cand == 0:
            return cand
    return F


def grouped_mlp(group_ids, x_padded, w1, w2, gates, *, tm=TM):
    """Grouped expert MLP over tile-aligned, expert-sorted rows.

    group_ids: [Rp // tm] int32  expert id owning each row tile (scalar prefetch)
    x_padded : [Rp, D]   bf16    expert-sorted rows, expert blocks tile-aligned
    w1       : [E, D, F] bf16
    w2       : [E, F, D] bf16
    gates    : [Rp, 1]   f32     router weight per row (0 for padding rows)
    returns  : [Rp, D]   bf16    gate-weighted per-row expert MLP output
    """
    Rp, D = x_padded.shape
    E, _, F = w1.shape
    assert Rp % tm == 0
    tf = _pick_inner_tile(F)
    assert F % tf == 0
    # TODO(synk): for very large n_embd also tile D; at typical MoE sizes the
    # (tm, D) activation block and the (D, tf)/(tf, D) weight blocks fit VMEM.
    return pl.pallas_call(
        _grouped_mlp_kernel,
        out_shape=jax.ShapeDtypeStruct((Rp, D), x_padded.dtype),
        grid_spec=pltpu.PrefetchScalarGridSpec(
            num_scalar_prefetch=1,
            grid=(Rp // tm, F // tf),
            in_specs=[
                pl.BlockSpec((tm, D), lambda t, f, gids: (t, 0)),
                pl.BlockSpec((1, D, tf), lambda t, f, gids: (gids[t], 0, f)),
                pl.BlockSpec((1, tf, D), lambda t, f, gids: (gids[t], f, 0)),
                pl.BlockSpec((tm, 1), lambda t, f, gids: (t, 0)),
            ],
            out_specs=pl.BlockSpec((tm, D), lambda t, f, gids: (t, 0)),
            scratch_shapes=[pltpu.VMEM((tm, D), jnp.float32)],
        ),
        compiler_params=pltpu.CompilerParams(
            dimension_semantics=("parallel", "arbitrary"),
            vmem_limit_bytes=64 * 1024 * 1024,
        ),
    )(group_ids, x_padded, w1, w2, gates)


# ------------------------------ full forward -------------------------------- #
def fp8_mlp_forward(x, wg_t, w1, w2, *, n_experts, top_k):
    D = x.shape[-1]
    x_flat = x.reshape(-1, D)
    T = x_flat.shape[0]
    E = n_experts
    K = top_k

    # Gating (Pallas matmul, f32 logits) -> softmax / top-k routing (glue).
    logits = gating_logits(x_flat, wg_t, E)                     # [T, E] f32
    weights = jax.nn.softmax(logits, axis=-1)
    multiplier, selected = jax.lax.top_k(weights, K)            # [T, K]
    expert_weights = multiplier.reshape(-1)                     # [T*K] f32
    top_experts = selected.reshape(-1).astype(jnp.int32)        # [T*K]

    # indices_and_bins (mega_ops sort / histogram / inclusive_cumsum as JAX glue)
    indices = jnp.argsort(top_experts).astype(jnp.int32)        # expert-sorted order
    bin_ids = top_experts[indices]                              # expert per sorted row
    tokens_per_expert = jnp.sum(
        top_experts[:, None] == jnp.arange(E, dtype=jnp.int32)[None, :], axis=0
    ).astype(jnp.int32)
    bins = jnp.cumsum(tokens_per_expert).astype(jnp.int32)
    starts = bins - tokens_per_expert

    # Tile-align each expert's row block (megablocks-style padded bins) so every
    # (TM, D) tile belongs to exactly one expert -> no masks, no accumulator over E.
    padded_tpe = ((tokens_per_expert + TM - 1) // TM) * TM
    padded_bins = jnp.cumsum(padded_tpe).astype(jnp.int32)
    padded_starts = padded_bins - padded_tpe
    # Static upper bound on the padded row count (multiple of TM).
    Rp = -(-(T * K + min(E, T * K) * (TM - 1)) // TM) * TM
    num_tiles = Rp // TM

    pos = jnp.arange(T * K, dtype=jnp.int32)
    dest = pos - starts[bin_ids] + padded_starts[bin_ids]       # padded row per sorted row
    src_token = indices // K                                    # original token per sorted row

    # mega_ops.gather: expert-sorted, tile-aligned copies of token rows + gates.
    x_padded = jnp.zeros((Rp, D), x.dtype).at[dest].set(x_flat[src_token])
    gates = jnp.zeros((Rp, 1), jnp.float32).at[dest, 0].set(expert_weights[indices])

    # Expert id owning each row tile (scalar-prefetch input driving the index_maps).
    tile_starts = jnp.arange(num_tiles, dtype=jnp.int32) * TM
    group_ids = jnp.minimum(
        jnp.searchsorted(padded_bins, tile_starts, side="right"), E - 1
    ).astype(jnp.int32)

    # Grouped expert MLP (Pallas); gate multiply already fused at writeback.
    out_padded = grouped_mlp(group_ids, x_padded, w1, w2, gates)    # [Rp, D] bf16

    # mega_ops.scatter: sum the top_k (already gate-weighted) contributions per token.
    y = jnp.zeros((T, D), jnp.float32).at[src_token].add(
        out_padded[dest].astype(jnp.float32)
    )
    return y.astype(x.dtype)                                    # [T, D] bf16


# ---------------------------- pure-JAX reference ---------------------------- #
def ref_forward(x, logits, w1, w2, *, top_k):
    D = x.shape[-1]
    x_flat = x.reshape(-1, D)
    T = x_flat.shape[0]
    weights = jax.nn.softmax(logits.astype(jnp.float32), axis=1)
    mult, sel = jax.lax.top_k(weights, top_k)
    xf = x_flat.astype(jnp.float32)
    h = jnp.einsum("td,edf->etf", xf, w1.astype(jnp.float32))
    h = jax.nn.gelu(h, approximate=True).astype(x.dtype).astype(jnp.float32)
    o = jnp.einsum("etf,efd->etd", h, w2.astype(jnp.float32)).astype(x.dtype)  # [E,T,D]
    y = jnp.zeros((T, D), jnp.float32)
    tok = jnp.arange(T)
    for k in range(top_k):
        y = y + mult[:, k][:, None] * o[sel[:, k], tok].astype(jnp.float32)
    return y.astype(x.dtype)


if __name__ == "__main__":
    n_embd, n_inner, n_experts, top_k = 32, 64, 4, 2
    batch, seq = 2, 8

    key = jax.random.PRNGKey(0)
    k1, k2, k3, k4 = jax.random.split(key, 4)
    x = jax.random.normal(k1, (batch, seq, n_embd)).astype(jnp.bfloat16)
    wg = (jax.random.normal(k2, (n_experts, n_embd)) / np.sqrt(n_embd)).astype(
        jnp.bfloat16
    )  # torch.nn.Linear(n_embd, n_experts, bias=False) weight: [n_experts, n_embd]
    w1 = (jax.random.normal(k3, (n_experts, n_embd, n_inner)) / np.sqrt(n_embd)).astype(
        jnp.bfloat16
    )
    w2 = (jax.random.normal(k4, (n_experts, n_inner, n_embd)) / np.sqrt(n_inner)).astype(
        jnp.bfloat16
    )
    wg_t = wg.T  # [n_embd, n_experts]

    fwd = jax.jit(functools.partial(fp8_mlp_forward, n_experts=n_experts, top_k=top_k))
    y = jax.block_until_ready(fwd(x, wg_t, w1, w2))

    # Correctness check of the Pallas path against a dense pure-JAX reference
    # (same gating logits so routing decisions are identical).
    logits = gating_logits(x.reshape(-1, n_embd), wg_t, n_experts)
    y_ref = ref_forward(x, logits, w1, w2, top_k=top_k)
    diff = np.max(np.abs(np.asarray(y, np.float32) - np.asarray(y_ref, np.float32)))
    assert diff < 2e-2, f"mismatch vs reference: max abs diff {diff}"

    print("KERNEL_OK")
</pallas_src>

<mosaic_0001>
module attributes {stable_mosaic.version = 11 : i64} {
  func.func @_gating_kernel(%arg0: i32, %arg1: memref<16x32xbf16, #tpu.memory_space<vmem>>, %arg2: memref<32x128xbf16, #tpu.memory_space<vmem>>, %arg3: memref<16x128xf32, #tpu.memory_space<vmem>>) attributes {dimension_semantics = [#tpu.dimension_semantics<parallel>], iteration_bounds = array<i64: 1>, scalar_prefetch = 0 : i64, scratch_operands = 0 : i64, tpu.core_type = #tpu.core_type<tc>, window_params = [{transform_indices = @transform_0, window_bounds = array<i64: 16, 32>}, {pipeline_mode = #tpu.pipeline_mode<synchronous>, transform_indices = @transform_1, window_bounds = array<i64: 32, 128>}, {transform_indices = @transform_2, window_bounds = array<i64: 16, 128>}]} {
    %c0 = arith.constant 0 : index
    %c0_0 = arith.constant 0 : index
    %0 = vector.load %arg1[%c0, %c0_0] : memref<16x32xbf16, #tpu.memory_space<vmem>>, vector<16x32xbf16>
    %c0_1 = arith.constant 0 : index
    %c0_2 = arith.constant 0 : index
    %1 = vector.load %arg2[%c0_1, %c0_2] : memref<32x128xbf16, #tpu.memory_space<vmem>>, vector<32x128xbf16>
    %cst = arith.constant dense<0.000000e+00> : vector<16x128xf32>
    %2 = tpu.matmul %0, %1, %cst {dimension_numbers = #tpu.dot_dimension_numbers<[1], [0], [0], [1], [0, 0, 1, 1], [], []>} : vector<16x32xbf16>, vector<32x128xbf16>, vector<16x128xf32> -> vector<16x128xf32>
    %c0_3 = arith.constant 0 : index
    %c0_4 = arith.constant 0 : index
    %3 = vector.load %arg3[%c0_3, %c0_4] : memref<16x128xf32, #tpu.memory_space<vmem>>, vector<16x128xf32>
    tpu.vector_store %arg3[%c0_3, %c0_4], %2 {strides = array<i32>} : memref<16x128xf32, #tpu.memory_space<vmem>>, vector<16x128xf32>,
    return
  }
  func.func @transform_0(%arg0: i32) -> (i32, i32) {
    %c0_i32 = arith.constant 0 : i32
    %c0_i32_0 = arith.constant 0 : i32
    return %arg0, %c0_i32 : i32, i32
  }
  func.func @transform_1(%arg0: i32) -> (i32, i32) {
    %c0_i32 = arith.constant 0 : i32
    %c0_i32_0 = arith.constant 0 : i32
    %c0_i32_1 = arith.constant 0 : i32
    return %c0_i32, %c0_i32_0 : i32, i32
  }
  func.func @transform_2(%arg0: i32) -> (i32, i32) {
    %c0_i32 = arith.constant 0 : i32
    %c0_i32_0 = arith.constant 0 : i32
    return %arg0, %c0_i32 : i32, i32
  }
}

module attributes {stable_mosaic.version = 11 : i64} {
  func.func @_grouped_mlp_kernel(%arg0: i32, %arg1: i32, %arg2: memref<5xi32, #tpu.memory_space<smem>>, %arg3: memref<256x32xbf16, #tpu.memory_space<vmem>>, %arg4: memref<1x32x64xbf16, #tpu.memory_space<vmem>>, %arg5: memref<1x64x32xbf16, #tpu.memory_space<vmem>>, %arg6: memref<256x1xf32, #tpu.memory_space<vmem>>, %arg7: memref<256x32xbf16, #tpu.memory_space<vmem>>, %arg8: memref<256x32xf32, #tpu.memory_space<vmem>>) attributes {dimension_semantics = [#tpu.dimension_semantics<parallel>, #tpu.dimension_semantics<arbitrary>], iteration_bounds = array<i64: 5, 1>, scalar_prefetch = 1 : i64, scratch_operands = 1 : i64, tpu.core_type = #tpu.core_type<tc>, window_params = [{transform_indices = @transform_0, window_bounds = array<i64: 256, 32>}, {transform_indices = @transform_1, window_bounds = array<i64: 1, 32, 64>}, {transform_indices = @transform_2, window_bounds = array<i64: 1, 64, 32>}, {transform_indices = @transform_3, window_bounds = array<i64: 256, 1>}, {transform_indices = @transform_4, window_bounds = array<i64: 256, 32>}]} {
    %c0_i32 = arith.constant 0 : i32
    %0 = arith.cmpi eq, %arg1, %c0_i32 : i32
    %1 = arith.extui %0 : i1 to i32
    %c0_i32_0 = arith.constant 0 : i32
    %2 = arith.cmpi ne, %1, %c0_i32_0 : i32
    scf.if %2 {
      %cst_19 = arith.constant 0.000000e+00 : f32
      %30 = vector.broadcast %cst_19 : f32 to vector<256x32xf32>
      %c0_20 = arith.constant 0 : index
      %c0_21 = arith.constant 0 : index
      %31 = vector.load %arg8[%c0_20, %c0_21] : memref<256x32xf32, #tpu.memory_space<vmem>>, vector<256x32xf32>
      tpu.vector_store %arg8[%c0_20, %c0_21], %30 {strides = array<i32>} : memref<256x32xf32, #tpu.memory_space<vmem>>, vector<256x32xf32>,
    } else {
    }
    %c0 = arith.constant 0 : index
    %c0_1 = arith.constant 0 : index
    %3 = vector.load %arg3[%c0, %c0_1] : memref<256x32xbf16, #tpu.memory_space<vmem>>, vector<256x32xbf16>
    %c0_2 = arith.constant 0 : index
    %c0_3 = arith.constant 0 : index
    %c0_4 = arith.constant 0 : index
    %4 = vector.load %arg4[%c0_2, %c0_3, %c0_4] : memref<1x32x64xbf16, #tpu.memory_space<vmem>>, vector<1x32x64xbf16>
    %5 = vector.shape_cast %4 : vector<1x32x64xbf16> to vector<32x64xbf16>
    %cst = arith.constant dense<0.000000e+00> : vector<256x64xf32>
    %6 = tpu.matmul %3, %5, %cst {dimension_numbers = #tpu.dot_dimension_numbers<[1], [0], [0], [1], [0, 0, 1, 1], [], []>} : vector<256x32xbf16>, vector<32x64xbf16>, vector<256x64xf32> -> vector<256x64xf32>
    %7 = arith.mulf %6, %6 : vector<256x64xf32>
    %8 = arith.mulf %6, %7 : vector<256x64xf32>
    %cst_5 = arith.constant 4.471500e-02 : f32
    %9 = vector.broadcast %cst_5 : f32 to vector<256x64xf32>
    %10 = arith.mulf %9, %8 : vector<256x64xf32>
    %11 = arith.addf %6, %10 : vector<256x64xf32>
    %cst_6 = arith.constant 0.797884583 : f32
    %12 = vector.broadcast %cst_6 : f32 to vector<256x64xf32>
    %13 = arith.mulf %12, %11 : vector<256x64xf32>
    %14 = math.tanh %13 : vector<256x64xf32>
    %cst_7 = arith.constant 1.000000e+00 : f32
    %15 = vector.broadcast %cst_7 : f32 to vector<256x64xf32>
    %16 = arith.addf %15, %14 : vector<256x64xf32>
    %cst_8 = arith.constant 5.000000e-01 : f32
    %17 = vector.broadcast %cst_8 : f32 to vector<256x64xf32>
    %18 = arith.mulf %17, %16 : vector<256x64xf32>
    %19 = arith.mulf %6, %18 : vector<256x64xf32>
    %20 = arith.truncf %19 : vector<256x64xf32> to vector<256x64xbf16>
    %c0_9 = arith.constant 0 : index
    %c0_10 = arith.constant 0 : index
    %21 = vector.load %arg8[%c0_9, %c0_10] : memref<256x32xf32, #tpu.memory_space<vmem>>, vector<256x32xf32>
    %c0_11 = arith.constant 0 : index
    %c0_12 = arith.constant 0 : index
    %c0_13 = arith.constant 0 : index
    %22 = vector.load %arg5[%c0_11, %c0_12, %c0_13] : memref<1x64x32xbf16, #tpu.memory_space<vmem>>, vector<1x64x32xbf16>
    %23 = vector.shape_cast %22 : vector<1x64x32xbf16> to vector<64x32xbf16>
    %cst_14 = arith.constant dense<0.000000e+00> : vector<256x32xf32>
    %24 = tpu.matmul %20, %23, %cst_14 {dimension_numbers = #tpu.dot_dimension_numbers<[1], [0], [0], [1], [0, 0, 1, 1], [], []>} : vector<256x64xbf16>, vector<64x32xbf16>, vector<256x32xf32> -> vector<256x32xf32>
    %25 = arith.addf %21, %24 : vector<256x32xf32>
    %c0_15 = arith.constant 0 : index
    %c0_16 = arith.constant 0 : index
    %26 = vector.load %arg8[%c0_15, %c0_16] : memref<256x32xf32, #tpu.memory_space<vmem>>, vector<256x32xf32>
    tpu.vector_store %arg8[%c0_15, %c0_16], %25 {strides = array<i32>} : memref<256x32xf32, #tpu.memory_space<vmem>>, vector<256x32xf32>,
    %c0_i32_17 = arith.constant 0 : i32
    %27 = arith.cmpi eq, %arg1, %c0_i32_17 : i32
    %28 = arith.extui %27 : i1 to i32
    %c0_i32_18 = arith.constant 0 : i32
    %29 = arith.cmpi ne, %28, %c0_i32_18 : i32
    scf.if %29 {
      %c0_19 = arith.constant 0 : index
      %c0_20 = arith.constant 0 : index
      %30 = vector.load %arg8[%c0_19, %c0_20] : memref<256x32xf32, #tpu.memory_space<vmem>>, vector<256x32xf32>
      %c0_21 = arith.constant 0 : index
      %c0_22 = arith.constant 0 : index
      %31 = vector.load %arg6[%c0_21, %c0_22] : memref<256x1xf32, #tpu.memory_space<vmem>>, vector<256x1xf32>
      %32 = vector.broadcast %31 : vector<256x1xf32> to vector<256x32xf32>
      %33 = arith.mulf %30, %32 : vector<256x32xf32>
      %34 = arith.truncf %33 : vector<256x32xf32> to vector<256x32xbf16>
      %c0_23 = arith.constant 0 : index
      %c0_24 = arith.constant 0 : index
      %35 = vector.load %arg7[%c0_23, %c0_24] : memref<256x32xbf16, #tpu.memory_space<vmem>>, vector<256x32xbf16>
      tpu.vector_store %arg7[%c0_23, %c0_24], %34 {strides = array<i32>} : memref<256x32xbf16, #tpu.memory_space<vmem>>, vector<256x32xbf16>,
    } else {
    }
    return
  }
  func.func @transform_0(%arg0: i32, %arg1: i32, %arg2: memref<5xi32, #tpu.memory_space<smem>>) -> (i32, i32) {
    %c0_i32 = arith.constant 0 : i32
    %c0_i32_0 = arith.constant 0 : i32
    return %arg0, %c0_i32 : i32, i32
  }
  func.func @transform_1(%arg0: i32, %arg1: i32, %arg2: memref<5xi32, #tpu.memory_space<smem>>) -> (i32, i32, i32) {
    %0 = arith.index_cast %arg0 : i32 to index
    %1 = memref.load %arg2[%0] : memref<5xi32, #tpu.memory_space<smem>>
    %c0_i32 = arith.constant 0 : i32
    %c0_i32_0 = arith.constant 0 : i32
    return %1, %c0_i32, %arg1 : i32, i32, i32
  }
  func.func @transform_2(%arg0: i32, %arg1: i32, %arg2: memref<5xi32, #tpu.memory_space<smem>>) -> (i32, i32, i32) {
    %0 = arith.index_cast %arg0 : i32 to index
    %1 = memref.load %arg2[%0] : memref<5xi32, #tpu.memory_space<smem>>
    %c0_i32 = arith.constant 0 : i32
    %c0_i32_0 = arith.constant 0 : i32
    return %1, %arg1, %c0_i32 : i32, i32, i32
  }
  func.func @transform_3(%arg0: i32, %arg1: i32, %arg2: memref<5xi32, #tpu.memory_space<smem>>) -> (i32, i32) {
    %c0_i32 = arith.constant 0 : i32
    %c0_i32_0 = arith.constant 0 : i32
    return %arg0, %c0_i32 : i32, i32
  }
  func.func @transform_4(%arg0: i32, %arg1: i32, %arg2: memref<5xi32, #tpu.memory_space<smem>>) -> (i32, i32) {
    %c0_i32 = arith.constant 0 : i32
    %c0_i32_0 = arith.constant 0 : i32
    return %arg0, %c0_i32 : i32, i32
  }
}

</mosaic_0001>

<bundles_post_ra>
// kernel: fp8_mlp_forward.2
= control target key start
LH: loop header
LB: loop body
LE: loop exit
PB: predicated region body
PF: predicated region fallthrough
CT: control target
= control target key end

     0   :  { %v106_v0 = vmov 0.0   ;;  %vm107_vm0 = vmmov 0   ;;  %vm35_vm1 = vcmask 261120   ;;  %s138_s1 = inlined_call_operand.vmem [shape: bf16[32,128], index: 1, kind: input, shape index: {}]   ;;  %s139_s0 = inlined_call_operand.vmem [shape: bf16[16,32], index: 0, kind: input, shape index: {}]   ;;  %s140_s2 = inlined_call_operand.vmem [shape: f32[16,128], index: 2, kind: output, shape index: {}]  }
   0x1   :  { %93 = vmatprep.subr.bf16.mxu0 %v106_v0  ;;  %v103_v1 = vld [vmem:[%s138_s1] sm:$0xff]   ;;  %97 = vmatprep.mubr.msk.bf16.mxu0 %vm107_vm0, %v106_v0  ;;  %v104_v2 = vld [vmem:[%s138_s1 + $0x8] sm:$0xff]  }
   0x2   :  { %94 = vmatpush3.bf16.msra.mxu0 %v103_v1  ;;  %v105_v3 = vld [vmem:[%s139_s0] sm:$0xff]  }
   0x3   :  { %95 = vmatprep.subr.bf16.mxu0 %v106_v0 }
   0x6   :  { %96 = vmatpush3.bf16.msra.mxu0 %v104_v2 }
   0x9   :  { %98 = vmatmul.mubr.msk.bf16.vlgmr.msra.gmra.mrb[0].mxu0 %vm35_vm1, %v105_v3 }
  0xdc   :  { %v73_v4 = vpop.f32.mrb[0].mxu0 }
  0xdd   :  { %80 = vst [vmem:[%s140_s2] sm:$0xff] %v73_v4  ;;  %v99_v5 = vpop.f32.mrb[1].mxu0 }
  0xde   :  { %v76_v6 = vpop.f32.mrb[2].mxu0 }
  0xdf   :  { %81 = vst [vmem:[%s140_s2 + $0x8] sm:$0xff] %v76_v6  ;;  %v100_v7 = vpop.f32.mrb[3].mxu0 }

// kernel: custom-call
= control target key start
LH: loop header
LB: loop body
LE: loop exit
PB: predicated region body
PF: predicated region fallthrough
CT: control target
= control target key end

     0   :  { %s6_s0 = inlined_call_operand.vmem [shape: u32[5], index: 0, kind: output, shape index: {}]  }

// kernel: fp8_mlp_forward.3
= control target key start
LH: loop header
LB: loop body
LE: loop exit
PB: predicated region body
PF: predicated region fallthrough
CT: control target
= control target key end

     0   :  { %s3760_s0 = inlined_call_operand.hbm [shape: s32[5], index: 0, kind: input, shape index: {}]   ;;  %s3761_s1 = inlined_call_operand.hbm [shape: bf16[1280,32], index: 1, kind: input, shape index: {}]   ;;  %s3762_s2 = inlined_call_operand.hbm [shape: bf16[4,32,64], index: 2, kind: input, shape index: {}]   ;;  %s3763_s3 = inlined_call_operand.hbm [shape: bf16[4,64,32], index: 3, kind: input, shape index: {}]   ;;  %s3764_s4 = inlined_call_operand.hbm [shape: f32[1280,1], index: 4, kind: input, shape index: {}]   ;;  %s3765_s5 = inlined_call_operand.hbm [shape: bf16[1280,32], index: 5, kind: output, shape index: {}]  }
   0x1   :  { %3788 = sst [smem:[#allocation35_spill]] %s3761_s1  ;;  %s2467_s20 = scalar_lea.hbm %s3760_s0, 16 }
   0x2   :  { %3789 = sst [smem:[#allocation36_spill]] %s3762_s2  ;;  %p2468_p0 = scmp.ne.s32.totalorder %s3760_s0, %s2467_s20 }
   0x3   :  { %3790 = sst [smem:[#allocation37_spill]] %s3765_s5  ;;  %p2471_p1 = scmp.lt.u32.totalorder %s2467_s20, %s3760_s0 }
   0x5   :  { %p2473_p2 = pnand %p2471_p1, %p2468_p0 }
   0x7   :  { %2476 = shalt.err (!%p2473_p2)  }
   0x8   :  { %s2743_s25 = smov [#allocation4]  }
   0x9   :  { %11 = dma.hbm_to_smem %s3760_s0, 16, %s2743_s25, [#allocation3] }
   0xa   :  { %2673 = dma.done.wait [#allocation3], 16 }
   0xb   :  { %2674 = vsyncadd [#allocation3], 4294967280 }
   0xc   :  { %13 = sfence }
   0xd   :  { %14 = vsyncpa [#allocation6], 0 }
   0xe   :  { %16 = vsyncpa [#allocation6 + $0x1], 0 }
   0xf   :  { %17 = vsyncpa [#allocation9], 0 }
  0x10   :  { %19 = vsyncpa [#allocation9 + $0x1], 0 }
  0x11   :  { %20 = vsyncpa [#allocation12], 0 }
  0x12   :  { %22 = vsyncpa [#allocation12 + $0x1], 0 }
  0x13   :  { %23 = vsyncpa [#allocation7], 0 }
  0x14   :  { %25 = vsyncpa [#allocation7 + $0x1], 0  ;;  %s2799_s28 = smov 0   ;;  %s2801_s29 = smov 0  }
  0x15   :  { %s2803_s30 = smov 0   ;;  %s2805_s6 = smov 0  }
  0x16   :  { %s2807_s0 = smov 0   ;;  %s2809_s7 = smov 0  }
  0x17   :  { %s2811_s8 = smov 0   ;;  %s2813_s9 = smov 0  }
  0x18   :  { %s2815_s10 = smov 0   ;;  %s2817_s11 = smov 0  }
  0x19   :  { %s2819_s12 = smov 0   ;;  %s2821_s13 = smov 0  }
  0x1a LB: > { %3791 = sst [smem:[#allocation24_spill]] %s2701_s29  ;;  %s2858_s14 = sadd.s32 4294967295, %s2741_s13   ;;  %s2741_s13 = sphi %s2821_s13, %s31_s13   ;;  %s2737_s12 = sphi %s2819_s12, %s3851_s12   ;;  %s2733_s11 = sphi %s2817_s11, %s3850_s11   ;;  %s2729_s10 = sphi %s2815_s10, %s3842_s10   ;;  %s2725_s9 = sphi %s2813_s9, %s3849_s9   ;;  %s2721_s8 = sphi %s2811_s8, %s3848_s8   ;;  %s2717_s7 = sphi %s2809_s7, %s3840_s7   ;;  %s2713_s0 = sphi %s2807_s0, %s3847_s0   ;;  %s2709_s6 = sphi %s2805_s6, %s3846_s6   ;;  %s2705_s30 = sphi %s2803_s30, %s3845_s30   ;;  %s2701_s29 = sphi %s2801_s29, %s3844_s29   ;;  %s2697_s28 = sphi %s2799_s28, %s3838_s28  }
  0x1b   : > { %3792 = sst [smem:[#allocation25_spill]] %s2717_s7  ;;  %s43_s15 = sadd.s32 1, %s2737_s12 }
  0x1c   : > { %3793 = sst [smem:[#allocation26_spill]] %s2721_s8  ;;  %p45_p3 = scmp.ge.s32.totalorder %s43_s15, 5 }
  0x1d   : > { %3794 = sst [smem:[#allocation27_spill]] %s2729_s10  ;;  %p3769_p4 = scmp.eq.s32.totalorder %s2741_s13, 0 }
  0x1e   : > { %3795 = sst [smem:[#allocation28_spill]] %s2733_s11  ;;  %p3768_p5 = scmp.eq.s32.totalorder %s2858_s14, 0 }
  0x1f   : > { %s73_s16 = sld [smem:[#allocation4 + %s2737_s12]]  ;;  %s3853_s15 = smov (%p45_p3, %s43_s15), 0 }
  0x20   : > { %3796 = sst [smem:[#allocation29_spill]] %s3853_s15  ;;  %s80_s17 = sadd.s32 1, %s2717_s7 }
  0x21   : > { %p87_p6 = scmp.ne.s32.totalorder %s2717_s7, %s2713_s0  ;;  %s74_s18 = sld [smem:[#allocation4 + %s3853_s15]] }
  0x22   : > { %p93_p7 = scmp.ne.s32.totalorder %s2713_s0, %s2709_s6  ;;  %p3767_p10 = scmp.lt.s32.totalorder %s2741_s13, 5 }
  0x23   : > { %p2873_p8 = por %p87_p6, %p3769_p4  ;;  %s220_s21 = sand.u32 1, %s2741_s13  }
  0x24   : > { %p2879_p9 = por %p93_p7, %p3768_p5  ;;  %s222_s22 = sand.u32 1, %s2717_s7  }
  0x25   : > { %s1980_s23 = sshll.u32 %s222_s22, 4  ;;  %p2904_p12 = pnand %p3767_p10, %p2873_p8 }
  0x26   : > { %s3798_s20 = scalar_select %p2879_p9, 1, 0 }
  0x27   : > { %s75_s24 = ssub.s32 %s73_s16, %s74_s18  ;;  %s224_s25 = scalar_lea.vmem [#allocation8], %s1980_s23 }
  0x28   : > { %p78_p11 = scmp.eq.s32.totalorder %s75_s24, 0  ;;  %s233_s26 = sshll.u32 %s224_s25, 4  ;;  %s2898_s26 = int_to_ptr.vmem [resolvable:$true] %s233_s26 }
  0x29   : > { %s2238_s27 = scalar_select %p2873_p8, [#allocation4], [#allocation14] }
  0x2a   : > { %s2889_s6 = scalar_select %p78_p11, %s2717_s7, %s80_s17  }
  0x2b   : > { %s2239_s5 = scalar_select %p2873_p8, %s2737_s12, 0 }
  0x2c   : > { %3799 = sst [smem:[#allocation30_spill]] %s2889_s6  ;;  %s3855_s27 = smov (!%p3767_p10, %s2238_s27), [#allocation16] }
  0x2d   : > { %s3857_s5 = smov (!%p3767_p10, %s2239_s5), 0  ;;  %p1989_p13 = scmp.ge.s32.totalorder %s2741_s13, 1 }
  0x2e   : > { %s225_s18 = sld [smem:[%s3855_s27 + %s3857_s5]]  ;;  %p286_p0 = scmp.lt.s32.totalorder %s2741_s13, 6 }
  0x2f   : > { %s3802_s2 = sld [smem:[#allocation36_spill]]  ;;  %s1974_s19 = sadd.s32 4294967294, %s2741_s13  }
  0x30   : > { %p2910_p1 = pnand %p1989_p13, %p286_p0  ;;  %s2920_s6 = scalar_lea.sflag [#allocation9], %s220_s21 }
  0x31   : > { %p2479_p3 = pneg %p2904_p12 }
  0x32   : > { %s3801_s17 = scalar_select %p2910_p1, 1, 0 }
  0x34   : > { %s2087_s22 = sshll.u32 %s225_s18, 8 }
  0x35   : > { %s2917_s25 = scalar_lea.hbm %s3802_s2, %s2087_s22  ;;  %s2482_s22 = scalar_lea.hbm %s3802_s2, 1024 }
  0x36   : > { %s2477_s5 = scalar_lea.hbm %s2917_s25, 256  ;;  %p2483_p8 = scmp.lt.u32.totalorder %s2917_s25, %s3802_s2 }
  0x37   : > { %p2478_p2 = scmp.ne.s32.totalorder %s2917_s25, %s2477_s5  ;;  %p2484_p11 = scmp.lt.u32.totalorder %s2482_s22, %s2477_s5 }
  0x38   : > { %p2486_p0 = scmp.lt.u32.totalorder %s2477_s5, %s2917_s25 }
  0x39   : > { %p2480_p6 = pnand %p2479_p3, %p2478_p2  ;;  %p2485_p13 = por %p2484_p11, %p2483_p8 }
  0x3b   : > { %p2481_p7 = pneg %p2480_p6  ;;  %p2487_p10 = por %p2486_p0, %p2485_p13 }
  0x3d   : > { %p2488_p5 = pnand %p2487_p10, %p2481_p7 }
  0x3f   : > { %2491 = shalt.err (!%p2488_p5)
}
  0x40   : > { %s2492_s21 = scalar_lea.vmem %s2898_s26, 256  ;;  %s2744_s27 = smov [#allocation8]  }
  0x41   : > { %p2493_p2 = scmp.ne.s32.totalorder %s2898_s26, %s2492_s21  ;;  %s2497_s18 = sshll.u32 %s2744_s27, 4  ;;  %s2498_s18 = int_to_ptr.vmem [resolvable:$false] %s2497_s18 }
  0x42   : > { %s2499_s23 = scalar_lea.vmem %s2498_s18, 512  ;;  %p2500_p9 = scmp.lt.s32.totalorder %s2898_s26, %s2498_s18 }
  0x43   : > { %p2495_p6 = pnand %p2493_p2, %p2479_p3  ;;  %p2501_p8 = scmp.lt.s32.totalorder %s2499_s23, %s2492_s21 }
  0x45   : > { %p2496_p4 = pneg %p2495_p6  ;;  %p2502_p11 = por %p2501_p8, %p2500_p9 }
  0x47   : > { %p2503_p13 = pnand %p2502_p11, %p2496_p4 }
  0x49   : > { %2506 = shalt.err (!%p2503_p13)
}
  0x4a   : > { %s3771_s5 = smov 64   ;;  %s3773_s22 = smov 4  }
  0x4b   : > { %2259 = dma.hbm_to_vmem [thread:$0]  (!%p2904_p12), %s2917_s25, 256, %s2898_s26, %s2920_s6, %s3771_s5, %s3771_s5, %s3773_s22  }
  0x4c   : > { %s47_s24 = ssub.s32 %s2737_s12, %s3853_s15  ;;  %s50_s21 = sadd.s32 1, %s2729_s10 }
  0x4d   : > { %p48_p4 = scmp.eq.s32.totalorder %s47_s24, 0  ;;  %p57_p5 = scmp.ne.s32.totalorder %s2729_s10, %s2725_s9 }
  0x4e   : > { %p63_p9 = scmp.ne.s32.totalorder %s2725_s9, %s2721_s8  ;;  %p173_p10 = scmp.eq.s32.totalorder %s2858_s14, 4 }
  0x4f   : > { %s2960_s27 = scalar_select %p48_p4, %s2729_s10, %s50_s21  }
  0x50   : > { %p3804_p3 = scmp.eq.s32.totalorder %s2741_s13, 0  ;;  %p3805_p0 = scmp.eq.s32.totalorder %s2858_s14, 0 }
  0x51   : > { %3803 = sst [smem:[#allocation31_spill]] %s2960_s27  ;;  %p2970_p6 = por %p173_p10, %p57_p5 }
  0x52   : > { %p59_p7 = por %p3804_p3, %p57_p5  ;;  %p2966_p2 = por %p3805_p0, %p63_p9 }
  0x53   : > { %s3807_s16 = scalar_select %p2970_p6, 1, 0 }
  0x54   : > { %s3806_s18 = scalar_select %p2966_p2, 1, 0 }
  0x55   : > { %3808 = sst [smem:[#allocation32_spill]] %s3807_s16  ;;  %p179_p12 = scmp.eq.s32.totalorder %s1974_s19, 4 }
  0x56   : > { %s2977_s26 = sand.u32 1, %s2729_s10   ;;  %s2086_s25 = sshll.u32 %s2737_s12, 11 }
  0x57   : > { %p2980_p8 = por %p179_p12, %p63_p9  ;;  %s1977_s24 = sshll.u32 %s2977_s26, 7 }
  0x58   : > { %s3811_s1 = sld [smem:[#allocation35_spill]]  ;;  %p3812_p11 = scmp.lt.s32.totalorder %s2741_s13, 5 }
  0x59   : > { %s3809_s23 = scalar_select %p2980_p8, 1, 0 }
  0x5a   : > { %p2992_p13 = pnand %p3812_p11, %p59_p7  ;;  %s203_s2 = scalar_lea.vmem [#allocation5], %s1977_s24 }
  0x5b   : > { %3810 = sst [smem:[#allocation33_spill]] %s3809_s23  ;;  %s210_s27 = sshll.u32 %s203_s2, 4  ;;  %s2996_s27 = int_to_ptr.vmem [resolvable:$true] %s210_s27 }
  0x5c   : > { %s200_s10 = scalar_lea.sflag [#allocation6], %s2977_s26  ;;  %p2509_p5 = pneg %p2992_p13 }
  0x5e   : > { %s2988_s22 = scalar_lea.hbm %s3811_s1, %s2086_s25  ;;  %s2512_s21 = scalar_lea.hbm %s3811_s1, 10240 }
  0x5f   : > { %s2507_s7 = scalar_lea.hbm %s2988_s22, 2048  ;;  %p2513_p3 = scmp.lt.u32.totalorder %s2988_s22, %s3811_s1 }
  0x60   : > { %p2508_p4 = scmp.ne.s32.totalorder %s2988_s22, %s2507_s7  ;;  %p2514_p7 = scmp.lt.u32.totalorder %s2512_s21, %s2507_s7 }
  0x61   : > { %p2516_p12 = scmp.lt.u32.totalorder %s2507_s7, %s2988_s22 }
  0x62   : > { %p2510_p9 = pnand %p2509_p5, %p2508_p4  ;;  %p2515_p0 = por %p2514_p7, %p2513_p3 }
  0x64   : > { %p2511_p10 = pneg %p2510_p9  ;;  %p2517_p11 = por %p2516_p12, %p2515_p0 }
  0x66   : > { %p2518_p8 = pnand %p2517_p11, %p2511_p10 }
  0x68   : > { %2521 = shalt.err (!%p2518_p8)
}
  0x69   : > { %s2522_s2 = scalar_lea.vmem %s2996_s27, 2048  ;;  %s2747_s24 = smov [#allocation5]  }
  0x6a   : > { %p2523_p4 = scmp.ne.s32.totalorder %s2996_s27, %s2522_s2  ;;  %s2527_s5 = sshll.u32 %s2747_s24, 4  ;;  %s2528_s5 = int_to_ptr.vmem [resolvable:$false] %s2527_s5 }
  0x6b   : > { %s2529_s8 = scalar_lea.vmem %s2528_s5, 4096  ;;  %p2530_p2 = scmp.lt.s32.totalorder %s2996_s27, %s2528_s5 }
  0x6c   : > { %p2525_p9 = pnand %p2523_p4, %p2509_p5  ;;  %p2531_p3 = scmp.lt.s32.totalorder %s2529_s8, %s2522_s2 }
  0x6e   : > { %p2526_p6 = pneg %p2525_p9  ;;  %p2532_p7 = por %p2531_p3, %p2530_p2 }
  0x70   : > { %p2533_p0 = pnand %p2532_p7, %p2526_p6 }
  0x72   : > { %2536 = shalt.err (!%p2533_p0)
}
  0x73   : > { %s3814_s7 = smov 4   ;;  %s3815_s23 = smov 64  }
  0x74   : > { %2254 = dma.hbm_to_vmem [thread:$0]  (!%p2992_p13), %s2988_s22, 2048, %s2996_s27, %s200_s10, %s3815_s23, %s3815_s23, %s3814_s7  }
  0x75   : > { %s103_s25 = sld [smem:[#allocation4 + %s2737_s12]]  ;;  %p117_p2 = scmp.ne.s32.totalorder %s2705_s30, %s2701_s29 }
  0x76   : > { %s104_s21 = sld [smem:[#allocation4 + %s3853_s15]]  ;;  %p123_p6 = scmp.ne.s32.totalorder %s2701_s29, %s2697_s28 }
  0x77   : > { %s110_s2 = sadd.s32 1, %s2705_s30  ;;  %s245_s24 = sand.u32 1, %s2705_s30  }
  0x78   : > { %p3816_p8 = scmp.eq.s32.totalorder %s2858_s14, 0  ;;  %p3819_p12 = scmp.eq.s32.totalorder %s2741_s13, 0 }
  0x79   : > { %s1983_s8 = sshll.u32 %s245_s24, 5  ;;  %s1986_s10 = sshll.u32 %s2977_s26, 8 }
  0x7a   : > { %p3039_p10 = por %p123_p6, %p3816_p8  ;;  %p119_p11 = por %p117_p2, %p3819_p12 }
  0x7b   : > { %p3820_p4 = scmp.lt.s32.totalorder %s2741_s13, 5  ;;  %s247_s28 = scalar_lea.vmem [#allocation10], %s1983_s8 }
  0x7c   : > { %s3817_s5 = scalar_select %p3039_p10, 1, 0 }
  0x7d   : > { %s105_s22 = ssub.s32 %s103_s25, %s104_s21  ;;  %p3048_p9 = pnand %p3820_p4, %p119_p11 }
  0x7e   : > { %3818 = sst [smem:[#allocation34_spill]] %s3817_s5  ;;  %p108_p3 = scmp.eq.s32.totalorder %s105_s22, 0 }
  0x7f   : > { %s3052_s1 = sshll.u32 %s247_s28, 4  ;;  %p3822_p7 = pmov %p3820_p4  ;;  %s3099_s1 = int_to_ptr.vmem [resolvable:$true] %s3052_s1 }
  0x80   : > { %s2241_s15 = scalar_select %p119_p11, [#allocation4], [#allocation15] }
  0x81   : > { %s3055_s16 = scalar_select %p108_p3, %s2705_s30, %s110_s2  }
  0x82   : > { %s2242_s11 = scalar_select %p119_p11, %s2737_s12, 0 }
  0x83   : > { %s3859_s15 = smov (!%p3822_p7, %s2241_s15), [#allocation17]  ;;  %p3823_p0 = pmov %p3820_p4 }
  0x84   : > { %s2089_s21 = sshll.u32 %s2737_s12, 12  ;;  %s271_s8 = scalar_lea.vmem [#allocation11], %s1986_s10 }
  0x85   : > { %s3861_s11 = smov (!%p3823_p0, %s2242_s11), 0  ;;  %s3068_s29 = scalar_lea.hbm %s3764_s4, %s2089_s21 }
  0x86   : > { %s3062_s25 = sld [smem:[%s3859_s15 + %s3861_s11]]  ;;  %s278_s2 = sshll.u32 %s271_s8, 4  ;;  %s3070_s2 = int_to_ptr.vmem [resolvable:$true] %s278_s2 }
  0x87   : > { %s268_s22 = scalar_lea.sflag [#allocation12], %s2977_s26  ;;  %s2537_s28 = scalar_lea.hbm %s3068_s29, 4096 }
  0x88   : > { %p2538_p2 = scmp.ne.s32.totalorder %s3068_s29, %s2537_s28  ;;  %s2542_s5 = scalar_lea.hbm %s3764_s4, 20480 }
  0x89   : > { %p2543_p12 = scmp.lt.u32.totalorder %s3068_s29, %s3764_s4  ;;  %p2544_p11 = scmp.lt.u32.totalorder %s2542_s5, %s2537_s28 }
  0x8a   : > { %p2540_p6 = pnand %p2538_p2, %p2509_p5  ;;  %p2546_p3 = scmp.lt.u32.totalorder %s2537_s28, %s3068_s29 }
  0x8b   : > { %p2545_p4 = por %p2544_p11, %p2543_p12 }
  0x8c   : > { %p2541_p8 = pneg %p2540_p6 }
  0x8d   : > { %p2547_p7 = por %p2546_p3, %p2545_p4 }
  0x8f   : > { %p2548_p0 = pnand %p2547_p7, %p2541_p8 }
  0x91   : > { %2551 = shalt.err (!%p2548_p0)
}
  0x92   : > { %s2552_s10 = scalar_lea.vmem %s3070_s2, 4096  ;;  %s2748_s8 = smov [#allocation11]  }
  0x93   : > { %p2553_p2 = scmp.ne.s32.totalorder %s3070_s2, %s2552_s10  ;;  %s2557_s11 = sshll.u32 %s2748_s8, 4  ;;  %s2558_s11 = int_to_ptr.vmem [resolvable:$false] %s2557_s11 }
  0x94   : > { %s2559_s15 = scalar_lea.vmem %s2558_s11, 8192  ;;  %p2560_p1 = scmp.lt.s32.totalorder %s3070_s2, %s2558_s11 }
  0x95   : > { %p2555_p6 = pnand %p2553_p2, %p2509_p5  ;;  %p2561_p12 = scmp.lt.s32.totalorder %s2559_s15, %s2552_s10 }
  0x97   : > { %p2556_p10 = pneg %p2555_p6  ;;  %p2562_p11 = por %p2561_p12, %p2560_p1 }
  0x99   : > { %p2563_p4 = pnand %p2562_p11, %p2556_p10 }
  0x9b   : > { %2566 = shalt.err (!%p2563_p4)
}
  0x9c   : > { %s2749_s28 = smov 128   ;;  %s2750_s5 = smov 8  }
  0x9d   : > { %2267 = dma.hbm_to_vmem [thread:$0]  (!%p2992_p13), %s3068_s29, 4096, %s3070_s2, %s268_s22, %s2749_s28, %s2749_s28, %s2750_s5  }
  0x9e   : > { %s2088_s21 = sshll.u32 %s3062_s25, 9  ;;  %p2569_p5 = pneg %p3048_p9 }
  0x9f   : > { %s3105_s8 = scalar_lea.hbm %s3763_s3, %s2088_s21  ;;  %s2572_s19 = scalar_lea.hbm %s3763_s3, 2048 }
  0xa0   : > { %s2567_s11 = scalar_lea.hbm %s3105_s8, 512  ;;  %p2573_p8 = scmp.lt.u32.totalorder %s3105_s8, %s3763_s3 }
  0xa1   : > { %p2568_p1 = scmp.ne.s32.totalorder %s3105_s8, %s2567_s11  ;;  %p2574_p3 = scmp.lt.u32.totalorder %s2572_s19, %s2567_s11 }
  0xa2   : > { %p2576_p0 = scmp.lt.u32.totalorder %s2567_s11, %s3105_s8 }
  0xa3   : > { %p2570_p10 = pnand %p2569_p5, %p2568_p1  ;;  %p2575_p7 = por %p2574_p3, %p2573_p8 }
  0xa5   : > { %p2571_p13 = pneg %p2570_p10  ;;  %p2577_p2 = por %p2576_p0, %p2575_p7 }
  0xa7   : > { %p2578_p6 = pnand %p2577_p2, %p2571_p13 }
  0xa9   : > { %2581 = shalt.err (!%p2578_p6)
}
  0xaa   : > { %s2582_s22 = scalar_lea.vmem %s3099_s1, 512  ;;  %s2751_s15 = smov [#allocation10]  }
  0xab   : > { %p2583_p12 = scmp.ne.s32.totalorder %s3099_s1, %s2582_s22  ;;  %s2587_s28 = sshll.u32 %s2751_s15, 4  ;;  %s2588_s28 = int_to_ptr.vmem [resolvable:$false] %s2587_s28 }
  0xac   : > { %s2589_s5 = scalar_lea.vmem %s2588_s28, 1024  ;;  %p2590_p1 = scmp.lt.s32.totalorder %s3099_s1, %s2588_s28 }
  0xad   : > { %p2585_p11 = pnand %p2583_p12, %p2569_p5  ;;  %p2591_p10 = scmp.lt.s32.totalorder %s2589_s5, %s2582_s22 }
  0xaf   : > { %p2586_p4 = pneg %p2585_p11  ;;  %p2592_p8 = por %p2591_p10, %p2590_p1 }
  0xb1   : > { %p2593_p3 = pnand %p2592_p8, %p2586_p4 }
  0xb3   : > { %2596 = shalt.err (!%p2593_p3)
}
  0xb4   : > { %2264 = dma.hbm_to_vmem [thread:$0]  (!%p3048_p9), %s3105_s8, 512, %s3099_s1, %s2920_s6, %s3815_s23, %s3815_s23, %s3814_s7  }
  0xb5   : > { %p3824_p5 = scmp.ne.s32.totalorder %s3801_s17, 0 }
  0xb6   : > { %s3139_s21 = sand.u32 (!%p3824_p5), 1, %s2725_s9   ;;  %p3825_p13 = scmp.ne.s32.totalorder (!%p3824_p5), %s3806_s18, 0 }
  0xb7   : > { %290 = sbr.rel (%p3824_p5) target bundleno = 776 (0x308), region = 36  ;;  %s1990_s24 = sshll.u32 (!%p3824_p5), %s3139_s21, 7 }
  0xb8   : > { %s293_s10 = scalar_lea.sflag (!%p3824_p5), [#allocation6], %s3139_s21  ;;  %s3145_s27 = scalar_lea.vmem (!%p3824_p5), [#allocation5], %s1990_s24 }
  0xbe   : > { %2676 = dma.done.wait (%p3825_p13), %s293_s10, 2048  }
  0xbf   : > { %2678 = vsyncadd (%p3825_p13), %s293_s10, 4294965248  ;;  %s301_s1 = sand.u32 1, %s2858_s14   ;;  %s303_s6 = sand.u32 1, %s2713_s0  }
  0xc0   : > { %s1991_s17 = sshll.u32 %s303_s6, 4  ;;  %s302_s7 = scalar_lea.sflag [#allocation9], %s301_s1 }
  0xc1   : > { %s305_s23 = scalar_lea.vmem [#allocation8], %s1991_s17  ;;  %p3826_p9 = scmp.ne.s32.totalorder %s3798_s20, 0 }
  0xc3   : > { %2680 = dma.done.wait (%p3826_p9), %s302_s7, 256  }
  0xc4   : > { %2682 = vsyncadd (%p3826_p9), %s302_s7, 4294967040  ;;  %s3827_s8 = sld [smem:[#allocation24_spill]]  ;;  %s3828_s11 = sld [smem:[#allocation34_spill]] }
  0xca   : > { %s312_s29 = sand.u32 1, %s3827_s8   ;;  %p3829_p7 = scmp.ne.s32.totalorder %s3828_s11, 0 }
  0xcb   : > { %s1992_s26 = sshll.u32 %s312_s29, 5 }
  0xcc   : > { %s3158_s19 = scalar_lea.vmem [#allocation10], %s1992_s26 }
  0xcd   : > { %2684 = dma.done.wait (%p3829_p7), %s302_s7, 512  }
  0xce   : > { %2686 = vsyncadd (%p3829_p7), %s302_s7, 4294966784  ;;  %s1993_s14 = sshll.u32 %s3139_s21, 8  ;;  %s320_s25 = scalar_lea.sflag [#allocation12], %s3139_s21 }
  0xcf   : > { %s3166_s2 = scalar_lea.vmem [#allocation11], %s1993_s14 }
  0xd0   : > { %2688 = dma.done.wait (%p3825_p13), %s320_s25, 4096  }
  0xd1   : > { %2690 = vsyncadd (%p3825_p13), %s320_s25, 4294963200  ;;  %v2381_v0 = vld [vmem:[%s305_s23] sm:$0xff]   ;;  %v2382_v1 = vld [vmem:[%s305_s23 + $0x8] sm:$0xff]   ;;  %vm374_vm0 = vcmask 261120   ;;  %v2752_v22 = vmov 0   ;;  %v2753_v57 = vmov 0.0  }
  0xd2   : > { %2161 = vmatprep.subr.bf16.mxu0 %v2381_v0  ;;  %v2383_v2 = vld [vmem:[%s3145_s27] sm:$0xff]   ;;  %v2384_v3 = vld [vmem:[%s3145_s27 + $0x8] sm:$0xff]   ;;  %v2385_v4 = vld [vmem:[%s3145_s27 + $0x10] sm:$0xff]   ;;  %2380 = vset.pattern.permute.xlu1 %v2752_v22  ;;  %377 = vst.msk [vmem:[#allocation2 + $0x10] sm:$0xff] %vm374_vm0, %v2753_v57  ;;  %vm1113_vm1 = vcmask 523264   ;;  %vm1774_vm2 = vcmask 257024  }
  0xd3   : > { %2162 = vmatpush3.bf16.msra.mxu0 %v2381_v0  ;;  %2165 = vmatprep.mubr.msk.bf16.mxu0 %vm374_vm0, %v2383_v2  ;;  %v2386_v5 = vld [vmem:[%s3145_s27 + $0x18] sm:$0xff]   ;;  %v2387_v6 = vld [vmem:[%s3145_s27 + $0x20] sm:$0xff]   ;;  %v2388_v7 = vld [vmem:[%s3145_s27 + $0x28] sm:$0xff]   ;;  %375 = vst.msk [vmem:[#allocation2] sm:$0xff] %vm374_vm0, %v2753_v57  ;;  %s3566_s20 = scalar_lea.vmem [#allocation13], %s1990_s24  ;;  %s3830_s18 = sld [smem:[#allocation28_spill]] }
  0xd4   : > { %2163 = vmatprep.subr.bf16.mxu0 %v2382_v1  ;;  %v2389_v8 = vld [vmem:[%s3145_s27 + $0x30] sm:$0xff]   ;;  %v2390_v9 = vld [vmem:[%s3145_s27 + $0x38] sm:$0xff]   ;;  %v2391_v10 = vld [vmem:[%s3145_s27 + $0x40] sm:$0xff]   ;;  %2379 = vset.pattern.permute.xlu0 %v2752_v22  ;;  %376 = vst.msk [vmem:[#allocation2 + $0x8] sm:$0xff] %vm374_vm0, %v2753_v57  ;;  %s1821_s15 = sshll.u32 %s3566_s20, 4  ;;  %s3831_s28 = sld [smem:[#allocation32_spill]]  ;;  %s3688_s15 = int_to_ptr.vmem [resolvable:$true] %s1821_s15 }
  0xd5   : > { %v2392_v11 = vld [vmem:[%s3145_s27 + $0x48] sm:$0xff]   ;;  %v2393_v12 = vld [vmem:[%s3145_s27 + $0x50] sm:$0xff]   ;;  %v2394_v13 = vld [vmem:[%s3145_s27 + $0x58] sm:$0xff]   ;;  %378 = vst.msk [vmem:[#allocation2 + $0x18] sm:$0xff] %vm374_vm0, %v2753_v57  ;;  %s3832_s10 = sld [smem:[#allocation37_spill]]  ;;  %s1808_s6 = scalar_lea.sflag [#allocation7], %s3139_s21 }
  0xd6   : > { %v2395_v14 = vld [vmem:[%s3145_s27 + $0x60] sm:$0xff]   ;;  %v2396_v15 = vld [vmem:[%s3145_s27 + $0x68] sm:$0xff]   ;;  %v2397_v16 = vld [vmem:[%s3145_s27 + $0x70] sm:$0xff]   ;;  %379 = vst.msk [vmem:[#allocation2 + $0x20] sm:$0xff] %vm374_vm0, %v2753_v57  ;;  %s2597_s17 = scalar_lea.vmem %s3688_s15, 2048  ;;  %s2754_s7 = smov [#allocation13]  }
  0xd7   : > { %2164 = vmatpush3.bf16.msra.mxu0 %v2382_v1  ;;  %v2398_v17 = vld [vmem:[%s3145_s27 + $0x78] sm:$0xff]   ;;  %v2399_v18 = vld [vmem:[%s3158_s19] sm:$0xff]   ;;  %v2400_v19 = vld [vmem:[%s3158_s19 + $0x8] sm:$0xff]   ;;  %380 = vst.msk [vmem:[#allocation2 + $0x28] sm:$0xff] %vm374_vm0, %v2753_v57  ;;  %p2598_p0 = scmp.ne.s32.totalorder %s3688_s15, %s2597_s17  ;;  %s2601_s23 = sshll.u32 %s2754_s7, 4  ;;  %s2602_s23 = int_to_ptr.vmem [resolvable:$false] %s2601_s23 }
  0xd8   : > { %2197 = vmatprep.subr.bf16.mxu1 %v2399_v18  ;;  %v2401_v20 = vld [vmem:[%s3158_s19 + $0x10] sm:$0xff]   ;;  %v2402_v21 = vld [vmem:[%s3158_s19 + $0x18] sm:$0xff]   ;;  %v1422_v24 = vld [vmem:[%s3166_s2] sm:$0xff]  ;;  %381 = vst.msk [vmem:[#allocation2 + $0x30] sm:$0xff] %vm374_vm0, %v2753_v57  ;;  %s2603_s8 = scalar_lea.vmem %s2602_s23, 4096  ;;  %p2604_p11 = scmp.lt.s32.totalorder %s3688_s15, %s2602_s23 }
  0xd9   : > { %2198 = vmatpush3.bf16.msra.mxu1 %v2399_v18  ;;  %v1424_v23 = vld [vmem:[%s3166_s2 + $0x10] sm:$0xff]  ;;  %1456 = vperm.xlu0 %2379, %v1422_v24   ;;  %v1425_v25 = vld [vmem:[%s3166_s2 + $0x18] sm:$0xff]  ;;  %v1423_v26 = vld [vmem:[%s3166_s2 + $0x8] sm:$0xff]  ;;  %382 = vst.msk [vmem:[#allocation2 + $0x38] sm:$0xff] %vm374_vm0, %v2753_v57  ;;  %s2122_s22 = sshll.u32 %s3830_s18, 11  ;;  %p2605_p4 = scmp.lt.s32.totalorder %s2603_s8, %s2597_s17 }
  0xda   : > { %2166 = vmatmul.mubr.msk.bf16.vlgmr.msra.gmra.mrb[0].mxu0 %vm374_vm0, %v2384_v3  ;;  %2199 = vmatprep.subr.bf16.mxu1 %v2400_v19  ;;  %v1427_v27 = vld [vmem:[%s3166_s2 + $0x28] sm:$0xff]  ;;  %v1426_v28 = vld [vmem:[%s3166_s2 + $0x20] sm:$0xff]  ;;  %v1429_v29 = vld [vmem:[%s3166_s2 + $0x38] sm:$0xff]  ;;  %383 = vst.msk [vmem:[#allocation2 + $0x40] sm:$0xff] %vm374_vm0, %v2753_v57  ;;  %p3834_p2 = scmp.ne.s32.totalorder %s3831_s28, 0 }
  0xdb   : > { %2169 = vmatprep.mubr.msk.bf16.mxu0 %vm374_vm0, %v2385_v4  ;;  %1466 = vperm.xlu1 %2380, %v1424_v23   ;;  %v1428_v30 = vld [vmem:[%s3166_s2 + $0x30] sm:$0xff]  ;;  %v1431_v31 = vld [vmem:[%s3166_s2 + $0x48] sm:$0xff]  ;;  %v1430_v32 = vld [vmem:[%s3166_s2 + $0x40] sm:$0xff]  ;;  %384 = vst.msk [vmem:[#allocation2 + $0x48] sm:$0xff] %vm374_vm0, %v2753_v57  ;;  %s3833_s27 = smov %s3832_s10  ;;  %s3686_s1 = scalar_lea.hbm %s3832_s10, %s2122_s22 }
  0xdc   : > { %v1433_v33 = vld [vmem:[%s3166_s2 + $0x58] sm:$0xff]  ;;  %v1432_v34 = vld [vmem:[%s3166_s2 + $0x50] sm:$0xff]  ;;  %v1435_v35 = vld [vmem:[%s3166_s2 + $0x68] sm:$0xff]  ;;  %385 = vst.msk [vmem:[#allocation2 + $0x50] sm:$0xff] %vm374_vm0, %v2753_v57  ;;  %p2599_p6 = pnand %p2598_p0, %p3834_p2  ;;  %p2606_p1 = por %p2605_p4, %p2604_p11 }
  0xdd   : > { %2200 = vmatpush3.bf16.msra.mxu1 %v2400_v19  ;;  %1461 = vperm.xlu0 %2379, %v1423_v26   ;;  %v1434_v36 = vld [vmem:[%s3166_s2 + $0x60] sm:$0xff]  ;;  %v1437_v37 = vld [vmem:[%s3166_s2 + $0x78] sm:$0xff]  ;;  %v1436_v38 = vld [vmem:[%s3166_s2 + $0x70] sm:$0xff]  ;;  %386 = vst.msk [vmem:[#allocation2 + $0x58] sm:$0xff] %vm374_vm0, %v2753_v57 }
  0xde   : > { %2201 = vmatprep.subr.bf16.mxu1 %v2401_v20  ;;  %v1439_v39 = vld [vmem:[%s3166_s2 + $0x88] sm:$0xff]  ;;  %v1438_v40 = vld [vmem:[%s3166_s2 + $0x80] sm:$0xff]  ;;  %v1441_v41 = vld [vmem:[%s3166_s2 + $0x98] sm:$0xff]  ;;  %387 = vst.msk [vmem:[#allocation2 + $0x60] sm:$0xff] %vm374_vm0, %v2753_v57  ;;  %p2600_p12 = pneg %p2599_p6 }
  0xdf   : > { %1471 = vperm.xlu1 %2380, %v1425_v25   ;;  %v1440_v42 = vld [vmem:[%s3166_s2 + $0x90] sm:$0xff]  ;;  %v1443_v43 = vld [vmem:[%s3166_s2 + $0xa8] sm:$0xff]  ;;  %v1442_v44 = vld [vmem:[%s3166_s2 + $0xa0] sm:$0xff]  ;;  %388 = vst.msk [vmem:[#allocation2 + $0x68] sm:$0xff] %vm374_vm0, %v2753_v57 }
  0xe0   : > { %v1445_v45 = vld [vmem:[%s3166_s2 + $0xb8] sm:$0xff]  ;;  %v1444_v46 = vld [vmem:[%s3166_s2 + $0xb0] sm:$0xff]  ;;  %v1447_v48 = vld [vmem:[%s3166_s2 + $0xc8] sm:$0xff]  ;;  %389 = vst.msk [vmem:[#allocation2 + $0x70] sm:$0xff] %vm374_vm0, %v2753_v57  ;;  %p2607_p10 = pnand %p2606_p1, %p2600_p12 }
  0xe1   : > { %2202 = vmatpush3.bf16.msra.mxu1 %v2401_v20  ;;  %1476 = vperm.xlu0 %2379, %v1426_v28   ;;  %v1446_v49 = vld [vmem:[%s3166_s2 + $0xc0] sm:$0xff]  ;;  %390 = vst.msk [vmem:[#allocation2 + $0x78] sm:$0xff] %vm374_vm0, %v2753_v57  ;;  %391 = vst.msk [vmem:[#allocation2 + $0x80] sm:$0xff] %vm374_vm0, %v2753_v57  ;;  %v1449_v60 = vld [vmem:[%s3166_s2 + $0xd8] sm:$0xff] }
  0xe2   : > { %2170 = vmatmul.mubr.msk.bf16.gmra.mrb[4].mxu0 %vm374_vm0, %v2386_v5  ;;  %2203 = vmatprep.subr.bf16.mxu1 %v2402_v21  ;;  %392 = vst.msk [vmem:[#allocation2 + $0x88] sm:$0xff] %vm374_vm0, %v2753_v57  ;;  %393 = vst.msk [vmem:[#allocation2 + $0x90] sm:$0xff] %vm374_vm0, %v2753_v57  ;;  %v1448_v61 = vld [vmem:[%s3166_s2 + $0xd0] sm:$0xff]  ;;  %v1453_v24 = vld [vmem:[%s3166_s2 + $0xf8] sm:$0xff] }
  0xe3   : > { %2173 = vmatprep.mubr.msk.bf16.mxu0 %vm374_vm0, %v2387_v6  ;;  %1481 = vperm.xlu1 %2380, %v1427_v27   ;;  %394 = vst.msk [vmem:[#allocation2 + $0x98] sm:$0xff] %vm374_vm0, %v2753_v57  ;;  %395 = vst.msk [vmem:[#allocation2 + $0xa0] sm:$0xff] %vm374_vm0, %v2753_v57  ;;  %v1452_v25 = vld [vmem:[%s3166_s2 + $0xf0] sm:$0xff] }
  0xe4   : > { %396 = vst.msk [vmem:[#allocation2 + $0xa8] sm:$0xff] %vm374_vm0, %v2753_v57  ;;  %397 = vst.msk [vmem:[#allocation2 + $0xb0] sm:$0xff] %vm374_vm0, %v2753_v57 }
  0xe5   : > { %2204 = vmatpush3.bf16.msra.mxu1 %v2402_v21  ;;  %1486 = vperm.xlu0 %2379, %v1428_v30   ;;  %398 = vst.msk [vmem:[#allocation2 + $0xb8] sm:$0xff] %vm374_vm0, %v2753_v57  ;;  %399 = vst.msk [vmem:[#allocation2 + $0xc0] sm:$0xff] %vm374_vm0, %v2753_v57 }
  0xe6   : > { %400 = vst.msk [vmem:[#allocation2 + $0xc8] sm:$0xff] %vm374_vm0, %v2753_v57  ;;  %401 = vst.msk [vmem:[#allocation2 + $0xd0] sm:$0xff] %vm374_vm0, %v2753_v57 }
  0xe7   : > { %1491 = vperm.xlu1 %2380, %v1429_v29   ;;  %402 = vst.msk [vmem:[#allocation2 + $0xd8] sm:$0xff] %vm374_vm0, %v2753_v57  ;;  %403 = vst.msk [vmem:[#allocation2 + $0xe0] sm:$0xff] %vm374_vm0, %v2753_v57 }
  0xe8   : > { %404 = vst.msk [vmem:[#allocation2 + $0xe8] sm:$0xff] %vm374_vm0, %v2753_v57  ;;  %405 = vst.msk [vmem:[#allocation2 + $0xf0] sm:$0xff] %vm374_vm0, %v2753_v57 }
  0xe9   : > { %1496 = vperm.xlu0 %2379, %v1430_v32   ;;  %406 = vst.msk [vmem:[#allocation2 + $0xf8] sm:$0xff] %vm374_vm0, %v2753_v57 }
  0xea   : > { %2174 = vmatmul.mubr.msk.bf16.gmra.mrb[8].mxu0 %vm374_vm0, %v2388_v7  ;;  %v1451_v7 = vld [vmem:[%s3166_s2 + $0xe8] sm:$0xff] }
  0xeb   : > { %2177 = vmatprep.mubr.msk.bf16.mxu0 %vm374_vm0, %v2389_v8  ;;  %1501 = vperm.xlu1 %2380, %v1431_v31   ;;  %v1450_v8 = vld [vmem:[%s3166_s2 + $0xe0] sm:$0xff] }
  0xed   : > { %1506 = vperm.xlu0 %2379, %v1432_v34  }
  0xef   : > { %1511 = vperm.xlu1 %2380, %v1433_v33  }
  0xf1   : > { %1516 = vperm.xlu0 %2379, %v1434_v36  }
  0xf2   : > { %2178 = vmatmul.mubr.msk.bf16.gmra.mrb[12].mxu0 %vm374_vm0, %v2390_v9 }
  0xf3   : > { %2181 = vmatprep.mubr.msk.bf16.mxu0 %vm374_vm0, %v2391_v10  ;;  %1521 = vperm.xlu1 %2380, %v1435_v35  }
  0xf5   : > { %1526 = vperm.xlu0 %2379, %v1436_v38  }
  0xf7   : > { %1531 = vperm.xlu1 %2380, %v1437_v37  }
  0xf9   : > { %1536 = vperm.xlu0 %2379, %v1438_v40  }
  0xfa   : > { %2182 = vmatmul.mubr.msk.bf16.gmra.mrb[16].mxu0 %vm374_vm0, %v2392_v11 }
  0xfb   : > { %2185 = vmatprep.mubr.msk.bf16.mxu0 %vm374_vm0, %v2393_v12  ;;  %1541 = vperm.xlu1 %2380, %v1439_v39  }
  0xfd   : > { %1546 = vperm.xlu0 %2379, %v1440_v42  }
  0xff   : > { %1551 = vperm.xlu1 %2380, %v1441_v41  }
 0x101   : > { %1556 = vperm.xlu0 %2379, %v1442_v44  }
 0x102   : > { %2186 = vmatmul.mubr.msk.bf16.gmra.mrb[20].mxu0 %vm374_vm0, %v2394_v13 }
 0x103   : > { %2189 = vmatprep.mubr.msk.bf16.mxu0 %vm374_vm0, %v2395_v14  ;;  %1561 = vperm.xlu1 %2380, %v1443_v43  }
 0x105   : > { %1566 = vperm.xlu0 %2379, %v1444_v46  }
 0x107   : > { %1571 = vperm.xlu1 %2380, %v1445_v45  }
 0x109   : > { %1576 = vperm.xlu0 %2379, %v1446_v49  }
 0x10a   : > { %2190 = vmatmul.mubr.msk.bf16.gmra.mrb[24].mxu0 %vm374_vm0, %v2396_v15 }
 0x10b   : > { %2193 = vmatprep.mubr.msk.bf16.mxu0 %vm374_vm0, %v2397_v16  ;;  %1581 = vperm.xlu1 %2380, %v1447_v48  }
 0x10d   : > { %1586 = vperm.xlu0 %2379, %v1448_v61  }
 0x10f   : > { %1591 = vperm.xlu1 %2380, %v1449_v60  }
 0x111   : > { %1596 = vperm.xlu0 %2379, %v1450_v8  }
 0x112   : > { %2194 = vmatmul.mubr.msk.bf16.gmra.mrb[28].mxu0 %vm374_vm0, %v2398_v17 }
 0x113   : > { %1601 = vperm.xlu1 %2380, %v1451_v7  }
 0x115   : > { %1606 = vperm.xlu0 %2379, %v1452_v25  }
 0x117   : > { %1611 = vperm.xlu1 %2380, %v1453_v24  }
 0x1ad   : > { %v3232_v47 = vpop.f32.mrb[0].mxu0 }
 0x1ae   : > { %v747_v50 = vmul.f32 %v3232_v47, %v3232_v47  ;;  %v3238_v51 = vpop.f32.mrb[1].mxu0 }
 0x1af   : > { %v745_v52 = vmul.f32 %v3238_v51, %v3238_v51  ;;  %v3242_v53 = vpop.f32.mrb[2].mxu0 }
 0x1b0   : > { %v779_v54 = vmul.f32 %v3232_v47, %v747_v50  ;;  %v748_v55 = vmul.f32 %v3242_v53, %v3242_v53  ;;  %v3247_v56 = vpop.f32.mrb[3].mxu0 }
 0x1b1   : > { %v777_v58 = vmul.f32 %v745_v52, %v3238_v51  ;;  %v746_v59 = vmul.f32 %v3247_v56, %v3247_v56 }
 0x1b2   : > { %v811_v62 = vmul.f32 0.044715, %v779_v54  ;;  %v780_v63 = vmul.f32 %v3242_v53, %v748_v55 }
 0x1b3   : > { %v809_v0 = vmul.f32 0.044715, %v777_v58  ;;  %v778_v1 = vmul.f32 %v746_v59, %v3247_v56 }
 0x1b4   : > { %v843_v2 = vadd.f32 %v3232_v47, %v811_v62  ;;  %v812_v3 = vmul.f32 0.044715, %v780_v63 }
 0x1b5   : > { %v841_v4 = vadd.f32 %v809_v0, %v3238_v51  ;;  %v810_v5 = vmul.f32 0.044715, %v778_v1  ;;  %v3290_v6 = vpop.f32.mrb[4].mxu0 }
 0x1b6   : > { %v875_v9 = vmul.f32 0.7978846, %v843_v2  ;;  %v844_v10 = vadd.f32 %v3242_v53, %v812_v3  ;;  %v751_v11 = vmul.f32 %v3290_v6, %v3290_v6  ;;  %v3297_v12 = vpop.f32.mrb[5].mxu0 }
 0x1b7   : > { %v873_v13 = vmul.f32 0.7978846, %v841_v4  ;;  %v842_v14 = vadd.f32 %v810_v5, %v3247_v56  ;;  %v749_v15 = vmul.f32 %v3297_v12, %v3297_v12  ;;  %v3302_v16 = vpop.f32.mrb[6].mxu0 }
 0x1b8   : > { %2403 = vtanh.f32 %v875_v9  ;;  %v876_v17 = vmul.f32 0.7978846, %v844_v10  ;;  %v783_v18 = vmul.f32 %v3290_v6, %v751_v11  ;;  %v752_v19 = vmul.f32 %v3302_v16, %v3302_v16  ;;  %v3307_v20 = vpop.f32.mrb[7].mxu0 }
 0x1b9   : > { %2405 = vtanh.f32 %v873_v13  ;;  %v874_v21 = vmul.f32 0.7978846, %v842_v14  ;;  %v781_v22 = vmul.f32 %v749_v15, %v3297_v12  ;;  %v750_v23 = vmul.f32 %v3307_v20, %v3307_v20 }
 0x1ba   : > { %2407 = vtanh.f32 %v876_v17  ;;  %v815_v26 = vmul.f32 0.044715, %v783_v18  ;;  %v784_v27 = vmul.f32 %v3302_v16, %v752_v19 }
 0x1bb   : > { %v813_v28 = vmul.f32 0.044715, %v781_v22  ;;  %v782_v29 = vmul.f32 %v750_v23, %v3307_v20  ;;  %2409 = vtanh.f32 %v874_v21 }
 0x1bc   : > { %v847_v30 = vadd.f32 %v3290_v6, %v815_v26  ;;  %v816_v31 = vmul.f32 0.044715, %v784_v27 }
 0x1bd   : > { %v845_v32 = vadd.f32 %v813_v28, %v3297_v12  ;;  %v814_v33 = vmul.f32 0.044715, %v782_v29  ;;  %v3318_v34 = vpop.f32.mrb[8].mxu0 }
 0x1be   : > { %v879_v35 = vmul.f32 0.7978846, %v847_v30  ;;  %v848_v36 = vadd.f32 %v3302_v16, %v816_v31  ;;  %v755_v37 = vmul.f32 %v3318_v34, %v3318_v34  ;;  %v3323_v38 = vpop.f32.mrb[9].mxu0 }
 0x1bf   : > { %v877_v39 = vmul.f32 0.7978846, %v845_v32  ;;  %v846_v40 = vadd.f32 %v814_v33, %v3307_v20  ;;  %v753_v41 = vmul.f32 %v3323_v38, %v3323_v38  ;;  %v3328_v42 = vpop.f32.mrb[10].mxu0 }
 0x1c0   : > { %2411 = vtanh.f32 %v879_v35  ;;  %v880_v43 = vmul.f32 0.7978846, %v848_v36  ;;  %v787_v44 = vmul.f32 %v3318_v34, %v755_v37  ;;  %v756_v45 = vmul.f32 %v3328_v42, %v3328_v42  ;;  %v3333_v46 = vpop.f32.mrb[11].mxu0 }
 0x1c1   : > { %2413 = vtanh.f32 %v877_v39  ;;  %v878_v48 = vmul.f32 0.7978846, %v846_v40  ;;  %v785_v49 = vmul.f32 %v753_v41, %v3323_v38  ;;  %v754_v50 = vmul.f32 %v3333_v46, %v3333_v46 }
 0x1c2   : > { %v2404_v52 = vpop.eup %2403  ;;  %2415 = vtanh.f32 %v880_v43  ;;  %v819_v54 = vmul.f32 0.044715, %v787_v44  ;;  %v788_v55 = vmul.f32 %v3328_v42, %v756_v45 }
 0x1c3   : > { %v2406_v57 = vpop.eup %2405  ;;  %v939_v58 = vadd.f32 1.0, %v2404_v52  ;;  %2417 = vtanh.f32 %v878_v48  ;;  %v817_v59 = vmul.f32 0.044715, %v785_v49  ;;  %v786_v60 = vmul.f32 %v754_v50, %v3333_v46 }
 0x1c4   : > { %v2408_v61 = vpop.eup %2407  ;;  %v851_v62 = vadd.f32 %v3318_v34, %v819_v54  ;;  %v820_v63 = vmul.f32 0.044715, %v788_v55  ;;  %v937_v9 = vadd.f32 1.0, %v2406_v57 }
 0x1c5   : > { %v849_v0 = vadd.f32 %v817_v59, %v3323_v38  ;;  %v818_v1 = vmul.f32 0.044715, %v786_v60  ;;  %v3342_v2 = vpop.f32.mrb[12].mxu0  ;;  %v2410_v3 = vpop.eup %2409  ;;  %v971_v10 = vmul.f32 0.5, %v939_v58  ;;  %v940_v11 = vadd.f32 1.0, %v2408_v61 }
 0x1c6   : > { %v883_v4 = vmul.f32 0.7978846, %v851_v62  ;;  %v852_v5 = vadd.f32 %v3328_v42, %v820_v63  ;;  %v759_v7 = vmul.f32 %v3342_v2, %v3342_v2  ;;  %v3347_v8 = vpop.f32.mrb[13].mxu0  ;;  %v938_v24 = vadd.f32 1.0, %v2410_v3 }
 0x1c7   : > { %v881_v13 = vmul.f32 0.7978846, %v849_v0  ;;  %v850_v14 = vadd.f32 %v818_v1, %v3333_v46  ;;  %v3350_v15 = vpop.f32.mrb[14].mxu0  ;;  %v757_v19 = vmul.f32 %v3347_v8, %v3347_v8  ;;  %v972_v30 = vmul.f32 0.5, %v940_v11 }
 0x1c8   : > { %2419 = vtanh.f32 %v883_v4  ;;  %v884_v17 = vmul.f32 0.7978846, %v852_v5  ;;  %v791_v18 = vmul.f32 %v3342_v2, %v759_v7  ;;  %v3355_v21 = vpop.f32.mrb[15].mxu0  ;;  %v760_v23 = vmul.f32 %v3350_v15, %v3350_v15 }
 0x1c9   : > { %2421 = vtanh.f32 %v881_v13  ;;  %v882_v22 = vmul.f32 0.7978846, %v850_v14  ;;  %v789_v27 = vmul.f32 %v757_v19, %v3347_v8  ;;  %v758_v28 = vmul.f32 %v3355_v21, %v3355_v21 }
 0x1ca   : > { %v2412_v25 = vpop.eup %2411  ;;  %2423 = vtanh.f32 %v884_v17  ;;  %v823_v26 = vmul.f32 0.044715, %v791_v18  ;;  %v792_v32 = vmul.f32 %v3350_v15, %v760_v23  ;;  %v3366_v41 = vmul.f32 %v3232_v47, %v971_v10 }
 0x1cb   : > { %v2414_v29 = vpop.eup %2413  ;;  %v943_v31 = vadd.f32 1.0, %v2412_v25  ;;  %2425 = vtanh.f32 %v882_v22  ;;  %v821_v37 = vmul.f32 0.044715, %v789_v27  ;;  %v790_v39 = vmul.f32 %v758_v28, %v3355_v21 }
 0x1cc   : > { %v2416_v33 = vpop.eup %2415  ;;  %v941_v35 = vadd.f32 1.0, %v2414_v29  ;;  %v855_v36 = vadd.f32 %v3342_v2, %v823_v26  ;;  %v824_v45 = vmul.f32 0.044715, %v792_v32  ;;  %v969_v55 = vmul.f32 0.5, %v937_v9 }
 0x1cd   : > { %v2418_v40 = vpop.eup %2417  ;;  %v975_v43 = vmul.f32 0.5, %v943_v31  ;;  %v944_v44 = vadd.f32 1.0, %v2416_v33  ;;  %v3368_v48 = vpop.f32.mrb[16].mxu0  ;;  %v853_v52 = vadd.f32 %v821_v37, %v3347_v8  ;;  %v1004_v57 = vmul.f32 %v3242_v53, %v972_v30 }
 0x1ce   : > { %v942_v49 = vadd.f32 1.0, %v2418_v40  ;;  %v887_v50 = vmul.f32 0.7978846, %v855_v36  ;;  %v3371_v54 = vpop.f32.mrb[17].mxu0  ;;  %v856_v58 = vadd.f32 %v3350_v15, %v824_v45  ;;  %v822_v59 = vmul.f32 0.044715, %v790_v39 }
 0x1cf   : > { %v970_v47 = vmul.f32 0.5, %v938_v24  ;;  %v3375_v60 = vpop.f32.mrb[18].mxu0  ;;  %v3378_v61 = vmul.f32 %v3290_v6, %v975_v43  ;;  %v973_v62 = vmul.f32 0.5, %v941_v35  ;;  %v885_v63 = vmul.f32 0.7978846, %v853_v52 }
 0x1d0   : > { %2427 = vtanh.f32 %v887_v50  ;;  %v3380_v0 = vpop.f32.mrb[19].mxu0  ;;  %v976_v1 = vmul.f32 0.5, %v944_v44  ;;  %v888_v3 = vmul.f32 0.7978846, %v856_v58  ;;  %v854_v4 = vadd.f32 %v822_v59, %v3355_v21 }
 0x1d1   : > { %v763_v53 = vmul.f32 %v3368_v48, %v3368_v48  ;;  %v974_v7 = vmul.f32 0.5, %v942_v49  ;;  %2429 = vtanh.f32 %v885_v63  ;;  %v761_v9 = vmul.f32 %v3371_v54, %v3371_v54 }
 0x1d2   : > { %v2420_v5 = vpop.eup %2419  ;;  %v1001_v6 = vmul.f32 %v969_v55, %v3238_v51  ;;  %2431 = vtanh.f32 %v888_v3  ;;  %v886_v13 = vmul.f32 0.7978846, %v854_v4  ;;  %v1002_v22 = vmul.f32 %v970_v47, %v3247_v56 }
 0x1d3   : > { %v2422_v10 = vpop.eup %2421  ;;  %v947_v11 = vadd.f32 1.0, %v2420_v5  ;;  %v795_v14 = vmul.f32 %v3368_v48, %v763_v53  ;;  %v793_v19 = vmul.f32 %v761_v9, %v3371_v54  ;;  %v764_v23 = vmul.f32 %v3375_v60, %v3375_v60 }
 0x1d4   : > { %v2424_v17 = vpop.eup %2423  ;;  %v945_v18 = vadd.f32 1.0, %v2422_v10  ;;  %2433 = vtanh.f32 %v886_v13  ;;  %v1005_v28 = vmul.f32 %v973_v62, %v3297_v12  ;;  %v1033_v31 = vpack.c.bf16 %v1002_v22, %v1001_v6 }
 0x1d5   : > { %v2426_v24 = vpop.eup %2425  ;;  %v979_v25 = vmul.f32 0.5, %v947_v11  ;;  %v948_v26 = vadd.f32 1.0, %v2424_v17  ;;  %v827_v51 = vmul.f32 0.044715, %v795_v14  ;;  %v3393_v27 = vpop.f32.mrb[20].mxu0  ;;  %v3399_v33 = vmul.f32 %v3302_v16, %v976_v1 }
 0x1d6   : > { %v946_v29 = vadd.f32 1.0, %v2426_v24  ;;  %v825_v30 = vmul.f32 0.044715, %v793_v19  ;;  %v3396_v32 = vpop.f32.mrb[21].mxu0  ;;  %v1006_v56 = vmul.f32 %v974_v7, %v3307_v20  ;;  %v796_v36 = vmul.f32 %v3375_v60, %v764_v23  ;;  %2205 = vmatprep.mubr.msk.bf16.mxu1 %vm1113_vm1, %v1033_v31 }
 0x1d7   : > { %v859_v35 = vadd.f32 %v3368_v48, %v827_v51  ;;  %v3404_v37 = vpop.f32.mrb[22].mxu0  ;;  %v3407_v39 = vmul.f32 %v3318_v34, %v979_v25  ;;  %v977_v12 = vmul.f32 0.5, %v945_v18  ;;  %v1034_v43 = vpack.c.bf16 %v1004_v57, %v3366_v41 }
 0x1d8   : > { %v857_v40 = vadd.f32 %v825_v30, %v3371_v54  ;;  %v3412_v16 = vpop.f32.mrb[23].mxu0  ;;  %v980_v44 = vmul.f32 0.5, %v948_v26  ;;  %v828_v45 = vmul.f32 0.044715, %v796_v36  ;;  %v762_v49 = vmul.f32 %v3380_v0, %v3380_v0 }
 0x1d9   : > { %v891_v20 = vmul.f32 0.7978846, %v859_v35  ;;  %v978_v52 = vmul.f32 0.5, %v946_v29  ;;  %2206 = vmatmul.mubr.msk.bf16.vlgmr.msra.gmra.mrb[0].mxu1 %vm1113_vm1, %v1034_v43  ;;  %v767_v34 = vmul.f32 %v3393_v27, %v3393_v27  ;;  %v765_v58 = vmul.f32 %v3396_v32, %v3396_v32 }
 0x1da   : > { %v2428_v50 = vpop.eup %2427  ;;  %v889_v55 = vmul.f32 0.7978846, %v857_v40  ;;  %v860_v57 = vadd.f32 %v3375_v60, %v828_v45  ;;  %v794_v59 = vmul.f32 %v762_v49, %v3380_v0  ;;  %v1035_v1 = vpack.c.bf16 %v1006_v56, %v1005_v28 }
 0x1db   : > { %v951_v41 = vadd.f32 1.0, %v2428_v50  ;;  %2435 = vtanh.f32 %v891_v20  ;;  %v2430_v47 = vpop.eup %2429  ;;  %v799_v62 = vmul.f32 %v3393_v27, %v767_v34  ;;  %v797_v63 = vmul.f32 %v765_v58, %v3396_v32 }
 0x1dc   : > { %2437 = vtanh.f32 %v889_v55  ;;  %v2432_v3 = vpop.eup %2431  ;;  %v949_v53 = vadd.f32 1.0, %v2430_v47  ;;  %v892_v5 = vmul.f32 0.7978846, %v860_v57  ;;  %v826_v7 = vmul.f32 0.044715, %v794_v59  ;;  %2209 = vmatprep.mubr.msk.bf16.mxu1 %vm1113_vm1, %v1035_v1 }
 0x1dd   : > { %v983_v4 = vmul.f32 0.5, %v951_v41  ;;  %v952_v9 = vadd.f32 1.0, %v2432_v3  ;;  %v831_v6 = vmul.f32 0.044715, %v799_v62  ;;  %v829_v10 = vmul.f32 0.044715, %v797_v63 }
 0x1de   : > { %v768_v11 = vmul.f32 %v3404_v37, %v3404_v37  ;;  %v3428_v13 = vpop.f32.mrb[24].mxu0  ;;  %v2434_v14 = vpop.eup %2433  ;;  %v1009_v17 = vmul.f32 %v977_v12, %v3323_v38  ;;  %v3432_v18 = vmul.f32 %v3328_v42, %v980_v44  ;;  %2439 = vtanh.f32 %v892_v5 }
 0x1df   : > { %v858_v19 = vadd.f32 %v826_v7, %v3380_v0  ;;  %v3435_v22 = vpop.f32.mrb[25].mxu0  ;;  %v1010_v23 = vmul.f32 %v978_v52, %v3333_v46  ;;  %v981_v24 = vmul.f32 0.5, %v949_v53  ;;  %v863_v25 = vadd.f32 %v3393_v27, %v831_v6 }
 0x1e0   : > { %v861_v26 = vadd.f32 %v829_v10, %v3396_v32  ;;  %v3440_v51 = vpop.f32.mrb[26].mxu0  ;;  %v3443_v28 = vmul.f32 %v3342_v2, %v983_v4  ;;  %v800_v42 = vmul.f32 %v3404_v37, %v768_v11  ;;  %v1036_v29 = vpack.c.bf16 %v3399_v33, %v3378_v61 }
 0x1e1   : > { %v890_v38 = vmul.f32 0.7978846, %v858_v19  ;;  %v3448_v30 = vpop.f32.mrb[27].mxu0  ;;  %v984_v31 = vmul.f32 0.5, %v952_v9  ;;  %v950_v46 = vadd.f32 1.0, %v2434_v14  ;;  %v766_v2 = vmul.f32 %v3412_v16, %v3412_v16 }
 0x1e2   : > { %v895_v56 = vmul.f32 0.7978846, %v863_v25  ;;  %v893_v35 = vmul.f32 0.7978846, %v861_v26  ;;  %v832_v36 = vmul.f32 0.044715, %v800_v42  ;;  %2210 = vmatmul.mubr.msk.bf16.gmra.mrb[4].mxu1 %vm1113_vm1, %v1036_v29  ;;  %v771_v12 = vmul.f32 %v3428_v13, %v3428_v13 }
 0x1e3   : > { %2441 = vtanh.f32 %v890_v38  ;;  %v3456_v40 = vmul.f32 %v981_v24, %v3347_v8  ;;  %v769_v61 = vmul.f32 %v3435_v22, %v3435_v22  ;;  %v1037_v33 = vpack.c.bf16 %v1010_v23, %v1009_v17 }
 0x1e4   : > { %2443 = vtanh.f32 %v895_v56  ;;  %v864_v44 = vadd.f32 %v3404_v37, %v832_v36  ;;  %v798_v20 = vmul.f32 %v766_v2, %v3412_v16  ;;  %v803_v45 = vmul.f32 %v3428_v13, %v771_v12 }
 0x1e5   : > { %v2436_v43 = vpop.eup %2435  ;;  %2445 = vtanh.f32 %v893_v35  ;;  %v3463_v49 = vpop.f32.mrb[28].mxu0  ;;  %v801_v8 = vmul.f32 %v769_v61, %v3435_v22  ;;  %2213 = vmatprep.mubr.msk.bf16.mxu1 %vm1113_vm1, %v1037_v33  ;;  %v772_v55 = vmul.f32 %v3440_v51, %v3440_v51  ;;  %v1038_v34 = vpack.c.bf16 %v3432_v18, %v3407_v39 }
 0x1e6   : > { %v2438_v50 = vpop.eup %2437  ;;  %v955_v52 = vadd.f32 1.0, %v2436_v43  ;;  %v3471_v58 = vpop.f32.mrb[29].mxu0  ;;  %v982_v41 = vmul.f32 0.5, %v950_v46  ;;  %v896_v57 = vmul.f32 0.7978846, %v864_v44  ;;  %v770_v47 = vmul.f32 %v3448_v30, %v3448_v30 }
 0x1e7   : > { %v830_v59 = vmul.f32 0.044715, %v798_v20  ;;  %v3475_v62 = vpop.f32.mrb[30].mxu0  ;;  %v3478_v63 = vmul.f32 %v3350_v15, %v984_v31  ;;  %v835_v1 = vmul.f32 0.044715, %v803_v45  ;;  %v804_v4 = vmul.f32 %v3440_v51, %v772_v55 }
 0x1e8   : > { %v833_v3 = vmul.f32 0.044715, %v801_v8  ;;  %v3481_v53 = vpop.f32.mrb[31].mxu0  ;;  %v2440_v39 = vpop.eup %2439  ;;  %v953_v5 = vadd.f32 1.0, %v2438_v50  ;;  %2447 = vtanh.f32 %v896_v57  ;;  %v802_v9 = vmul.f32 %v770_v47, %v3448_v30 }
 0x1e9   : > { %v862_v7 = vadd.f32 %v830_v59, %v3412_v16  ;;  %v987_v6 = vmul.f32 0.5, %v955_v52  ;;  %v956_v10 = vadd.f32 1.0, %v2440_v39  ;;  %v867_v11 = vadd.f32 %v3428_v13, %v835_v1 }
 0x1ea   : > { %v865_v15 = vadd.f32 %v833_v3, %v3435_v22  ;;  %v1014_v14 = vmul.f32 %v982_v41, %v3355_v21  ;;  %v836_v18 = vmul.f32 0.044715, %v804_v4  ;;  %2214 = vmatmul.mubr.msk.bf16.gmra.mrb[8].mxu1 %vm1113_vm1, %v1038_v34  ;;  %v834_v19 = vmul.f32 0.044715, %v802_v9 }
 0x1eb   : > { %v894_v17 = vmul.f32 0.7978846, %v862_v7  ;;  %v988_v23 = vmul.f32 0.5, %v956_v10  ;;  %v899_v24 = vmul.f32 0.7978846, %v867_v11  ;;  %v775_v26 = vmul.f32 %v3463_v49, %v3463_v49 }
 0x1ec   : > { %v897_v25 = vmul.f32 0.7978846, %v865_v15  ;;  %v868_v42 = vadd.f32 %v3440_v51, %v836_v18  ;;  %v866_v29 = vadd.f32 %v834_v19, %v3448_v30  ;;  %v773_v21 = vmul.f32 %v3471_v58, %v3471_v58 }
 0x1ed   : > { %v2442_v38 = vpop.eup %2441  ;;  %2449 = vtanh.f32 %v894_v17  ;;  %v985_v46 = vmul.f32 0.5, %v953_v5  ;;  %v807_v35 = vmul.f32 %v3463_v49, %v775_v26  ;;  %v3497_v2 = vmul.f32 %v3368_v48, %v987_v6 }
 0x1ee   : > { %v2444_v31 = vpop.eup %2443  ;;  %v954_v56 = vadd.f32 1.0, %v2442_v38  ;;  %2451 = vtanh.f32 %v899_v24  ;;  %v900_v12 = vmul.f32 0.7978846, %v868_v42  ;;  %v898_v61 = vmul.f32 0.7978846, %v866_v29 }
 0x1ef   : > { %v2446_v36 = vpop.eup %2445  ;;  %2453 = vtanh.f32 %v897_v25  ;;  %v959_v43 = vadd.f32 1.0, %v2444_v31  ;;  %v839_v44 = vmul.f32 0.044715, %v807_v35  ;;  %v805_v20 = vmul.f32 %v773_v21, %v3471_v58 }
 0x1f0   : > { %v986_v33 = vmul.f32 0.5, %v954_v56  ;;  %v1020_v45 = vmul.f32 %v3375_v60, %v988_v23  ;;  %2455 = vtanh.f32 %v900_v12  ;;  %v1039_v50 = vpack.c.bf16 %v1014_v14, %v3456_v40 }
 0x1f1   : > { %v776_v52 = vmul.f32 %v3475_v62, %v3475_v62  ;;  %v1017_v8 = vmul.f32 %v985_v46, %v3371_v54  ;;  %2457 = vtanh.f32 %v898_v61  ;;  %v871_v55 = vadd.f32 %v3463_v49, %v839_v44 }
 0x1f2   : > { %v1018_v48 = vmul.f32 %v986_v33, %v3380_v0  ;;  %v2448_v34 = vpop.eup %2447  ;;  %v957_v41 = vadd.f32 1.0, %v2446_v36  ;;  %v837_v57 = vmul.f32 0.044715, %v805_v20  ;;  %2217 = vmatprep.mubr.msk.bf16.mxu1 %vm1113_vm1, %v1039_v50  ;;  %v1040_v40 = vpack.c.bf16 %v3478_v63, %v3443_v28 }
 0x1f3   : > { %v808_v60 = vmul.f32 %v3475_v62, %v776_v52  ;;  %v991_v59 = vmul.f32 0.5, %v959_v43  ;;  %v960_v47 = vadd.f32 1.0, %v2448_v34  ;;  %v903_v1 = vmul.f32 0.7978846, %v871_v55 }
 0x1f4   : > { %v774_v54 = vmul.f32 %v3481_v53, %v3481_v53  ;;  %v869_v0 = vadd.f32 %v837_v57, %v3471_v58  ;;  %2218 = vmatmul.mubr.msk.bf16.gmra.mrb[12].mxu1 %vm1113_vm1, %v1040_v40  ;;  %v1041_v4 = vpack.c.bf16 %v1018_v48, %v1017_v8  ;;  %v1042_v39 = vpack.c.bf16 %v1020_v45, %v3497_v2 }
 0x1f5   : > { %v840_v3 = vmul.f32 0.044715, %v808_v60  ;;  %v992_v5 = vmul.f32 0.5, %v960_v47  ;;  %2459 = vtanh.f32 %v903_v1  ;;  %v989_v28 = vmul.f32 0.5, %v957_v41  ;;  %v1457_v1 = vpop.permute.xlu0 %1456 }
 0x1f6   : > { %v806_v7 = vmul.f32 %v774_v54, %v3481_v53  ;;  %v901_v63 = vmul.f32 0.7978846, %v869_v0  ;;  %2221 = vmatprep.mubr.msk.bf16.mxu1 %vm1113_vm1, %v1041_v4  ;;  %v1023_v11 = vmul.f32 %v3393_v27, %v991_v59  ;;  %v1467_v54 = vpop.permute.xlu1 %1466 }
 0x1f7   : > { %v2450_v9 = vpop.eup %2449  ;;  %v872_v6 = vadd.f32 %v3475_v62, %v840_v3  ;;  %v1024_v15 = vmul.f32 %v3404_v37, %v992_v5  ;;  %v1021_v29 = vmul.f32 %v989_v28, %v3396_v32 }
 0x1f8   : > { %v2452_v10 = vpop.eup %2451  ;;  %v958_v14 = vadd.f32 1.0, %v2450_v9  ;;  %v838_v17 = vmul.f32 0.044715, %v806_v7  ;;  %2461 = vtanh.f32 %v901_v63  ;;  %v1052_v7 = vld [vmem:[#allocation2 + $0x18] sm:$0xff]  ;;  %v1050_v63 = vld [vmem:[#allocation2 + $0x8] sm:$0xff] }
 0x1f9   : > { %v2454_v18 = vpop.eup %2453  ;;  %v963_v19 = vadd.f32 1.0, %v2452_v10  ;;  %v904_v23 = vmul.f32 0.7978846, %v872_v6  ;;  %v1044_v38 = vpack.c.bf16 %v1024_v15, %v1023_v11  ;;  %v1462_v0 = vpop.permute.xlu0 %1461 }
 0x1fa   : > { %v990_v24 = vmul.f32 0.5, %v958_v14  ;;  %v961_v25 = vadd.f32 1.0, %v2454_v18  ;;  %v870_v26 = vadd.f32 %v838_v17, %v3481_v53  ;;  %v2456_v42 = vpop.eup %2455  ;;  %v1472_v3 = vpop.permute.xlu1 %1471 }
 0x1fb   : > { %2463 = vtanh.f32 %v904_v23  ;;  %v2458_v21 = vpop.eup %2457  ;;  %v995_v31 = vmul.f32 0.5, %v963_v19  ;;  %v964_v37 = vadd.f32 1.0, %v2456_v42  ;;  %v1055_v19 = vld [vmem:[#allocation2 + $0x30] sm:$0xff]  ;;  %v1053_v23 = vld [vmem:[#allocation2 + $0x20] sm:$0xff] }
 0x1fc   : > { %v1022_v27 = vmul.f32 %v990_v24, %v3412_v16  ;;  %v902_v46 = vmul.f32 0.7978846, %v870_v26  ;;  %v993_v56 = vmul.f32 0.5, %v961_v25  ;;  %v962_v35 = vadd.f32 1.0, %v2458_v21  ;;  %2222 = vmatmul.mubr.msk.bf16.gmra.mrb[16].mxu1 %vm1113_vm1, %v1042_v39  ;;  %v1056_v26 = vld [vmem:[#allocation2 + $0x38] sm:$0xff]  ;;  %v1054_v21 = vld [vmem:[#allocation2 + $0x28] sm:$0xff] }
 0x1fd   : > { %v996_v36 = vmul.f32 0.5, %v964_v37  ;;  %v1027_v33 = vmul.f32 %v3428_v13, %v995_v31 }
 0x1fe   : > { %2465 = vtanh.f32 %v902_v46  ;;  %v1043_v2 = vpack.c.bf16 %v1022_v27, %v1021_v29  ;;  %v994_v12 = vmul.f32 0.5, %v962_v35  ;;  %v1025_v16 = vmul.f32 %v993_v56, %v3435_v22 }
 0x1ff   : > { %v2460_v61 = vpop.eup %2459  ;;  %v1028_v32 = vmul.f32 %v3440_v51, %v996_v36 }
 0x200   : > { %2225 = vmatprep.mubr.msk.bf16.mxu1 %vm1113_vm1, %v1043_v2  ;;  %v1026_v43 = vmul.f32 %v994_v12, %v3448_v30  ;;  %v967_v44 = vadd.f32 1.0, %v2460_v61 }
 0x201   : > { %v1046_v20 = vpack.c.bf16 %v1028_v32, %v1027_v33 }
 0x202   : > { %v2462_v45 = vpop.eup %2461  ;;  %v1045_v50 = vpack.c.bf16 %v1026_v43, %v1025_v16  ;;  %v999_v48 = vmul.f32 0.5, %v967_v44 }
 0x203   : > { %v965_v8 = vadd.f32 1.0, %v2462_v45 }
 0x204   : > { %2226 = vmatmul.mubr.msk.bf16.gmra.mrb[20].mxu1 %vm1113_vm1, %v1044_v38  ;;  %v1031_v22 = vmul.f32 %v3463_v49, %v999_v48  ;;  %v3539_v49 = vpop.permute.xlu0 %1476 }
 0x205   : > { %v2464_v52 = vpop.eup %2463  ;;  %2229 = vmatprep.mubr.msk.bf16.mxu1 %vm1113_vm1, %v1045_v50  ;;  %v997_v34 = vmul.f32 0.5, %v965_v8  ;;  %v1059_v50 = vld [vmem:[#allocation2 + $0x50] sm:$0xff]  ;;  %v1057_v8 = vld [vmem:[#allocation2 + $0x40] sm:$0xff] }
 0x206   : > { %v968_v55 = vadd.f32 1.0, %v2464_v52 }
 0x207   : > { %v1029_v40 = vmul.f32 %v997_v34, %v3471_v58  ;;  %v1051_v58 = vld [vmem:[#allocation2 + $0x10] sm:$0xff] }
 0x208   : > { %v2466_v13 = vpop.eup %2465  ;;  %v1000_v51 = vmul.f32 0.5, %v968_v55  ;;  %v3543_v4 = vpop.permute.xlu0 %1486 }
 0x209   : > { %v966_v41 = vadd.f32 1.0, %v2466_v13  ;;  %v1060_v13 = vld [vmem:[#allocation2 + $0x58] sm:$0xff] }
 0x20a   : > { %v1032_v30 = vmul.f32 %v3475_v62, %v1000_v51  ;;  %v3541_v62 = vpop.permute.xlu1 %1481 }
 0x20b   : > { %v998_v57 = vmul.f32 0.5, %v966_v41  ;;  %v1058_v41 = vld [vmem:[#allocation2 + $0x48] sm:$0xff] }
 0x20c   : > { %v1048_v60 = vpack.c.bf16 %v1032_v30, %v1031_v22  ;;  %2230 = vmatmul.mubr.msk.bf16.gmra.mrb[24].mxu1 %vm1113_vm1, %v1046_v20  ;;  %v3547_v11 = vpop.permute.xlu0 %1496 }
 0x20d   : > { %v1030_v59 = vmul.f32 %v998_v57, %v3481_v53  ;;  %v1049_v53 = vld [vmem:[#allocation2] sm:$0xff] }
 0x20e   : > { %v3545_v39 = vpop.permute.xlu1 %1491 }
 0x20f   : > { %v1047_v47 = vpack.c.bf16 %v1030_v59, %v1029_v40 }
 0x210   : > { %v3555_v24 = vpop.permute.xlu0 %1506 }
 0x211   : > { %2233 = vmatprep.mubr.msk.bf16.mxu1 %vm1113_vm1, %v1047_v47 }
 0x212   : > { %v3551_v18 = vpop.permute.xlu1 %1501 }
 0x214   : > { %2234 = vmatmul.mubr.msk.bf16.gmra.mrb[28].mxu1 %vm1113_vm1, %v1048_v60  ;;  %v3562_v20 = vpop.permute.xlu0 %1516 }
 0x216   : > { %v3557_v27 = vpop.permute.xlu1 %1511 }
 0x21a   : > { %v3573_v48 = vpop.permute.xlu1 %1521 }
 0x2ac   : > { %v2207_v5 = vpop.f32.mrb[0].mxu1 }
 0x2ad   : > { %v1325_v9 = vadd.f32 %v2207_v5, %v1051_v58  ;;  %v1196_v28 = vpop.f32.mrb[1].mxu1  ;;  %v3587_v5 = vpop.permute.xlu1 %1531 }
 0x2ae   : > { %v1323_v6 = vadd.f32 %v1196_v28, %v1049_v53  ;;  %v2208_v10 = vpop.f32.mrb[2].mxu1 }
 0x2af   : > { %1357 = vst.msk [vmem:[#allocation2 + $0x10] sm:$0xff] %vm374_vm0, %v1325_v9  ;;  %v1326_v15 = vadd.f32 %v2208_v10, %v1052_v7  ;;  %v1199_v14 = vpop.f32.mrb[3].mxu1 }
 0x2b0   : > { %1355 = vst.msk [vmem:[#allocation2] sm:$0xff] %vm374_vm0, %v1323_v6  ;;  %v1324_v17 = vadd.f32 %v1199_v14, %v1050_v63  ;;  %v1063_v63 = vld [vmem:[#allocation2 + $0x70] sm:$0xff]  ;;  %v1064_v14 = vld [vmem:[#allocation2 + $0x78] sm:$0xff] }
 0x2b1   : > { %1358 = vst.msk [vmem:[#allocation2 + $0x18] sm:$0xff] %vm374_vm0, %v1326_v15 }
 0x2b2   : > { %1356 = vst.msk [vmem:[#allocation2 + $0x8] sm:$0xff] %vm374_vm0, %v1324_v17 }
 0x2b5   : > { %v2211_v25 = vpop.f32.mrb[4].mxu1 }
 0x2b6   : > { %v1392_v38 = vld [vmem:[#allocation2 + $0x10] sm:$0xff]  ;;  %v1329_v42 = vadd.f32 %v2211_v25, %v1055_v19  ;;  %v1212_v29 = vpop.f32.mrb[5].mxu1  ;;  %v1062_v25 = vld [vmem:[#allocation2 + $0x68] sm:$0xff] }
 0x2b7   : > { %v1616_v31 = vmul.f32 %v1467_v54, %v1392_v38  ;;  %v1390_v37 = vld [vmem:[#allocation2] sm:$0xff]  ;;  %v1327_v46 = vadd.f32 %v1212_v29, %v1053_v23  ;;  %v2212_v56 = vpop.f32.mrb[6].mxu1 }
 0x2b8   : > { %v1614_v35 = vmul.f32 %v1457_v1, %v1390_v37  ;;  %v1393_v36 = vld [vmem:[#allocation2 + $0x18] sm:$0xff]  ;;  %1361 = vst.msk [vmem:[#allocation2 + $0x30] sm:$0xff] %vm374_vm0, %v1329_v42  ;;  %v1330_v2 = vadd.f32 %v2212_v56, %v1056_v26  ;;  %v1215_v12 = vpop.f32.mrb[7].mxu1  ;;  %v3581_v1 = vpop.permute.xlu0 %1526 }
 0x2b9   : > { %v2092_v61 = vpack.c.bf16 %v1616_v31, %v1616_v31  ;;  %v1617_v33 = vmul.f32 %v1472_v3, %v1393_v36  ;;  %v1391_v32 = vld [vmem:[#allocation2 + $0x8] sm:$0xff]  ;;  %1359 = vst.msk [vmem:[#allocation2 + $0x20] sm:$0xff] %vm374_vm0, %v1327_v46  ;;  %v1328_v16 = vadd.f32 %v1215_v12, %v1054_v21  ;;  %v3602_v26 = vpop.permute.xlu1 %1541 }
 0x2ba   : > { %v2090_v43 = vpack.c.bf16 %v1614_v35, %v1614_v35  ;;  %v1615_v44 = vmul.f32 %v1462_v0, %v1391_v32  ;;  %1362 = vst.msk [vmem:[#allocation2 + $0x38] sm:$0xff] %vm374_vm0, %v1330_v2 }
 0x2bb   : > { %1777 = vst.msk [vmem:[%s3566_s20 + $0x8] sm:$0xf] %vm1774_vm2, %v2092_v61  ;;  %v2093_v45 = vpack.c.bf16 %v1617_v33, %v1617_v33  ;;  %v1067_v61 = vld [vmem:[#allocation2 + $0x90] sm:$0xff]  ;;  %v1065_v33 = vld [vmem:[#allocation2 + $0x80] sm:$0xff] }
 0x2bc   : > { %1360 = vst.msk [vmem:[#allocation2 + $0x28] sm:$0xff] %vm374_vm0, %v1328_v16  ;;  %v2091_v52 = vpack.c.bf16 %v1615_v44, %v1615_v44  ;;  %v3597_v6 = vpop.permute.xlu0 %1536  ;;  %v1068_v16 = vld [vmem:[#allocation2 + $0x98] sm:$0xff] }
 0x2bd   : > { %1775 = vst.msk [vmem:[%s3566_s20] sm:$0xf] %vm1774_vm2, %v2090_v43  ;;  %1778 = vst.msk [vmem:[%s3566_s20 + $0xc] sm:$0xf] %vm1774_vm2, %v2093_v45  ;;  %v2215_v55 = vpop.f32.mrb[8].mxu1  ;;  %v1552_v32 = vpop.permute.xlu1 %1551  ;;  %v1066_v45 = vld [vmem:[#allocation2 + $0x88] sm:$0xff] }
 0x2be   : > { %1776 = vst.msk [vmem:[%s3566_s20 + $0x4] sm:$0xf] %vm1774_vm2, %v2091_v52  ;;  %v1333_v51 = vadd.f32 %v2215_v55, %v1059_v50  ;;  %v1228_v34 = vpop.f32.mrb[9].mxu1 }
 0x2bf   : > { %v1396_v22 = vld [vmem:[#allocation2 + $0x30] sm:$0xff]  ;;  %v1331_v30 = vadd.f32 %v1228_v34, %v1057_v8  ;;  %v2216_v57 = vpop.f32.mrb[10].mxu1 }
 0x2c0   : > { %v1620_v60 = vmul.f32 %v3543_v4, %v1396_v22  ;;  %v1394_v40 = vld [vmem:[#allocation2 + $0x20] sm:$0xff]  ;;  %1365 = vst.msk [vmem:[#allocation2 + $0x50] sm:$0xff] %vm374_vm0, %v1333_v51  ;;  %v1334_v59 = vadd.f32 %v2216_v57, %v1060_v13  ;;  %v1231_v47 = vpop.f32.mrb[11].mxu1  ;;  %v1547_v12 = vpop.permute.xlu0 %1546 }
 0x2c1   : > { %v1618_v54 = vmul.f32 %v3539_v49, %v1394_v40  ;;  %v1397_v0 = vld [vmem:[#allocation2 + $0x38] sm:$0xff]  ;;  %1363 = vst.msk [vmem:[#allocation2 + $0x40] sm:$0xff] %vm374_vm0, %v1331_v30  ;;  %v1332_v3 = vadd.f32 %v1231_v47, %v1058_v41  ;;  %v3627_v47 = vpop.permute.xlu1 %1561 }
 0x2c2   : > { %v2096_v58 = vpack.c.bf16 %v1620_v60, %v1620_v60  ;;  %v1621_v4 = vmul.f32 %v3545_v39, %v1397_v0  ;;  %1366 = vst.msk [vmem:[#allocation2 + $0x58] sm:$0xff] %vm374_vm0, %v1334_v59  ;;  %v1061_v39 = vld [vmem:[#allocation2 + $0x60] sm:$0xff] }
 0x2c3   : > { %v1395_v53 = vld [vmem:[#allocation2 + $0x28] sm:$0xff]  ;;  %v2094_v7 = vpack.c.bf16 %v1618_v54, %v1618_v54  ;;  %1364 = vst.msk [vmem:[#allocation2 + $0x48] sm:$0xff] %vm374_vm0, %v1332_v3  ;;  %v1069_v3 = vld [vmem:[#allocation2 + $0xa0] sm:$0xff] }
 0x2c4   : > { %v1619_v9 = vmul.f32 %v3541_v62, %v1395_v53  ;;  %1781 = vst.msk [vmem:[%s3566_s20 + $0x18] sm:$0xf] %vm1774_vm2, %v2096_v58  ;;  %v2097_v49 = vpack.c.bf16 %v1621_v4, %v1621_v4  ;;  %v3621_v41 = vpop.permute.xlu0 %1556  ;;  %v1072_v53 = vld [vmem:[#allocation2 + $0xb8] sm:$0xff] }
 0x2c5   : > { %1779 = vst.msk [vmem:[%s3566_s20 + $0x10] sm:$0xf] %vm1774_vm2, %v2094_v7 }
 0x2c6   : > { %v2095_v28 = vpack.c.bf16 %v1619_v9, %v1619_v9  ;;  %1782 = vst.msk [vmem:[%s3566_s20 + $0x1c] sm:$0xf] %vm1774_vm2, %v2097_v49  ;;  %v1070_v9 = vld [vmem:[#allocation2 + $0xa8] sm:$0xff] }
 0x2c7   : > { %v1400_v10 = vld [vmem:[#allocation2 + $0x50] sm:$0xff]  ;;  %v2219_v15 = vpop.f32.mrb[12].mxu1 }
 0x2c8   : > { %1780 = vst.msk [vmem:[%s3566_s20 + $0x14] sm:$0xf] %vm1774_vm2, %v2095_v28  ;;  %v1624_v62 = vmul.f32 %v3555_v24, %v1400_v10  ;;  %v1398_v17 = vld [vmem:[#allocation2 + $0x40] sm:$0xff]  ;;  %v1337_v19 = vadd.f32 %v2219_v15, %v1063_v63  ;;  %v1244_v23 = vpop.f32.mrb[13].mxu1  ;;  %v1567_v49 = vpop.permute.xlu0 %1566 }
 0x2c9   : > { %v1622_v38 = vmul.f32 %v3547_v11, %v1398_v17  ;;  %v1401_v42 = vld [vmem:[#allocation2 + $0x58] sm:$0xff]  ;;  %v1335_v29 = vadd.f32 %v1244_v23, %v1061_v39  ;;  %v2220_v21 = vpop.f32.mrb[14].mxu1 }
 0x2ca   : > { %v2100_v31 = vpack.c.bf16 %v1624_v62, %v1624_v62  ;;  %v1625_v37 = vmul.f32 %v3557_v27, %v1401_v42  ;;  %v1399_v46 = vld [vmem:[#allocation2 + $0x48] sm:$0xff]  ;;  %1369 = vst.msk [vmem:[#allocation2 + $0x70] sm:$0xff] %vm374_vm0, %v1337_v19  ;;  %v1338_v24 = vadd.f32 %v2220_v21, %v1064_v14  ;;  %v1247_v56 = vpop.f32.mrb[15].mxu1  ;;  %v1572_v62 = vpop.permute.xlu1 %1571 }
 0x2cb   : > { %v2098_v35 = vpack.c.bf16 %v1622_v38, %v1622_v38  ;;  %v1623_v36 = vmul.f32 %v3551_v18, %v1399_v46  ;;  %1367 = vst.msk [vmem:[#allocation2 + $0x60] sm:$0xff] %vm374_vm0, %v1335_v29  ;;  %v1336_v11 = vadd.f32 %v1247_v56, %v1062_v25 }
 0x2cc   : > { %1785 = vst.msk [vmem:[%s3566_s20 + $0x28] sm:$0xf] %vm1774_vm2, %v2100_v31  ;;  %v2101_v2 = vpack.c.bf16 %v1625_v37, %v1625_v37  ;;  %v1075_v31 = vld [vmem:[#allocation2 + $0xd0] sm:$0xff]  ;;  %v1073_v37 = vld [vmem:[#allocation2 + $0xc0] sm:$0xff]  ;;  %v1577_v46 = vpop.permute.xlu0 %1576 }
 0x2cd   : > { %1370 = vst.msk [vmem:[#allocation2 + $0x78] sm:$0xff] %vm374_vm0, %v1338_v24  ;;  %v2099_v27 = vpack.c.bf16 %v1623_v36, %v1623_v36  ;;  %1368 = vst.msk [vmem:[#allocation2 + $0x68] sm:$0xff] %vm374_vm0, %v1336_v11 }
 0x2ce   : > { %1783 = vst.msk [vmem:[%s3566_s20 + $0x20] sm:$0xf] %vm1774_vm2, %v2098_v35  ;;  %1786 = vst.msk [vmem:[%s3566_s20 + $0x2c] sm:$0xf] %vm1774_vm2, %v2101_v2  ;;  %v1076_v35 = vld [vmem:[#allocation2 + $0xd8] sm:$0xff]  ;;  %v1074_v2 = vld [vmem:[#allocation2 + $0xc8] sm:$0xff] }
 0x2cf   : > { %1784 = vst.msk [vmem:[%s3566_s20 + $0x24] sm:$0xf] %vm1774_vm2, %v2099_v27  ;;  %v2223_v18 = vpop.f32.mrb[16].mxu1 }
 0x2d0   : > { %v1341_v43 = vadd.f32 %v2223_v18, %v1067_v61  ;;  %v1260_v44 = vpop.f32.mrb[17].mxu1 }
 0x2d1   : > { %v1404_v50 = vld [vmem:[#allocation2 + $0x70] sm:$0xff]  ;;  %v1339_v52 = vadd.f32 %v1260_v44, %v1065_v33  ;;  %v2224_v8 = vpop.f32.mrb[18].mxu1 }
 0x2d2   : > { %v1628_v55 = vmul.f32 %v3581_v1, %v1404_v50  ;;  %v1402_v13 = vld [vmem:[#allocation2 + $0x60] sm:$0xff]  ;;  %1373 = vst.msk [vmem:[#allocation2 + $0x90] sm:$0xff] %vm374_vm0, %v1341_v43  ;;  %v1342_v51 = vadd.f32 %v2224_v8, %v1068_v16  ;;  %v1263_v34 = vpop.f32.mrb[19].mxu1 }
 0x2d3   : > { %v1626_v22 = vmul.f32 %v3562_v20, %v1402_v13  ;;  %1371 = vst.msk [vmem:[#allocation2 + $0x80] sm:$0xff] %vm374_vm0, %v1339_v52  ;;  %v1340_v57 = vadd.f32 %v1263_v34, %v1066_v45  ;;  %v1071_v20 = vld [vmem:[#allocation2 + $0xb0] sm:$0xff] }
 0x2d4   : > { %v1405_v30 = vld [vmem:[#allocation2 + $0x78] sm:$0xff]  ;;  %v2104_v60 = vpack.c.bf16 %v1628_v55, %v1628_v55  ;;  %v1403_v59 = vld [vmem:[#allocation2 + $0x68] sm:$0xff]  ;;  %1374 = vst.msk [vmem:[#allocation2 + $0x98] sm:$0xff] %vm374_vm0, %v1342_v51  ;;  %v1587_v55 = vpop.permute.xlu0 %1586  ;;  %v1079_v34 = vld [vmem:[#allocation2 + $0xf0] sm:$0xff] }
 0x2d5   : > { %v1629_v40 = vmul.f32 %v3587_v5, %v1405_v30  ;;  %v2102_v1 = vpack.c.bf16 %v1626_v22, %v1626_v22  ;;  %v1627_v54 = vmul.f32 %v3573_v48, %v1403_v59  ;;  %1372 = vst.msk [vmem:[#allocation2 + $0x88] sm:$0xff] %vm374_vm0, %v1340_v57  ;;  %v1077_v22 = vld [vmem:[#allocation2 + $0xe0] sm:$0xff] }
 0x2d6   : > { %1789 = vst.msk [vmem:[%s3566_s20 + $0x38] sm:$0xf] %vm1774_vm2, %v2104_v60 }
 0x2d7   : > { %v2105_v0 = vpack.c.bf16 %v1629_v40, %v1629_v40  ;;  %1787 = vst.msk [vmem:[%s3566_s20 + $0x30] sm:$0xf] %vm1774_vm2, %v2102_v1  ;;  %v2103_v58 = vpack.c.bf16 %v1627_v54, %v1627_v54  ;;  %v2227_v4 = vpop.f32.mrb[20].mxu1  ;;  %v1080_v40 = vld [vmem:[#allocation2 + $0xf8] sm:$0xff]  ;;  %v1078_v54 = vld [vmem:[#allocation2 + $0xe8] sm:$0xff] }
 0x2d8   : > { %v1345_v5 = vadd.f32 %v2227_v4, %v1071_v20  ;;  %v1276_v7 = vpop.f32.mrb[21].mxu1 }
 0x2d9   : > { %1790 = vst.msk [vmem:[%s3566_s20 + $0x3c] sm:$0xf] %vm1774_vm2, %v2105_v0  ;;  %1788 = vst.msk [vmem:[%s3566_s20 + $0x34] sm:$0xf] %vm1774_vm2, %v2103_v58  ;;  %v1408_v48 = vld [vmem:[#allocation2 + $0x90] sm:$0xff]  ;;  %v1343_v28 = vadd.f32 %v1276_v7, %v1069_v3  ;;  %v2228_v63 = vpop.f32.mrb[22].mxu1 }
 0x2da   : > { %v1632_v39 = vmul.f32 %v1547_v12, %v1408_v48  ;;  %v1406_v10 = vld [vmem:[#allocation2 + $0x80] sm:$0xff]  ;;  %1377 = vst.msk [vmem:[#allocation2 + $0xb0] sm:$0xff] %vm374_vm0, %v1345_v5  ;;  %v1346_v15 = vadd.f32 %v2228_v63, %v1072_v53  ;;  %v1279_v14 = vpop.f32.mrb[23].mxu1  ;;  %v1597_v5 = vpop.permute.xlu0 %1596 }
 0x2db   : > { %v1630_v17 = vmul.f32 %v3597_v6, %v1406_v10  ;;  %v1409_v19 = vld [vmem:[#allocation2 + $0x98] sm:$0xff]  ;;  %1375 = vst.msk [vmem:[#allocation2 + $0xa0] sm:$0xff] %vm374_vm0, %v1343_v28  ;;  %v1344_v23 = vadd.f32 %v1279_v14, %v1070_v9 }
 0x2dc   : > { %v2108_v25 = vpack.c.bf16 %v1632_v39, %v1632_v39  ;;  %v1633_v38 = vmul.f32 %v1552_v32, %v1409_v19  ;;  %v1407_v42 = vld [vmem:[#allocation2 + $0x88] sm:$0xff]  ;;  %1378 = vst.msk [vmem:[#allocation2 + $0xb8] sm:$0xff] %vm374_vm0, %v1346_v15 }
 0x2dd   : > { %v2106_v29 = vpack.c.bf16 %v1630_v17, %v1630_v17  ;;  %v1631_v21 = vmul.f32 %v3602_v26, %v1407_v42  ;;  %1376 = vst.msk [vmem:[#allocation2 + $0xa8] sm:$0xff] %vm374_vm0, %v1344_v23  ;;  %v1582_v26 = vpop.permute.xlu1 %1581 }
 0x2de   : > { %1793 = vst.msk [vmem:[%s3566_s20 + $0x48] sm:$0xf] %vm1774_vm2, %v2108_v25  ;;  %v2109_v6 = vpack.c.bf16 %v1633_v38, %v1633_v38  ;;  %v1607_v17 = vpop.permute.xlu0 %1606 }
 0x2df   : > { %1791 = vst.msk [vmem:[%s3566_s20 + $0x40] sm:$0xf] %vm1774_vm2, %v2106_v29  ;;  %v2107_v24 = vpack.c.bf16 %v1631_v21, %v1631_v21  ;;  %v2231_v56 = vpop.f32.mrb[24].mxu1 }
 0x2e0   : > { %1794 = vst.msk [vmem:[%s3566_s20 + $0x4c] sm:$0xf] %vm1774_vm2, %v2109_v6  ;;  %v1349_v36 = vadd.f32 %v2231_v56, %v1075_v31  ;;  %v1292_v11 = vpop.f32.mrb[25].mxu1 }
 0x2e1   : > { %1792 = vst.msk [vmem:[%s3566_s20 + $0x44] sm:$0xf] %vm1774_vm2, %v2107_v24  ;;  %v1412_v12 = vld [vmem:[#allocation2 + $0xb0] sm:$0xff]  ;;  %v1347_v27 = vadd.f32 %v1292_v11, %v1073_v37  ;;  %v2232_v61 = vpop.f32.mrb[26].mxu1  ;;  %v1592_v30 = vpop.permute.xlu1 %1591 }
 0x2e2   : > { %v1636_v33 = vmul.f32 %v1567_v49, %v1412_v12  ;;  %v1410_v32 = vld [vmem:[#allocation2 + $0xa0] sm:$0xff]  ;;  %1381 = vst.msk [vmem:[#allocation2 + $0xd0] sm:$0xff] %vm374_vm0, %v1349_v36  ;;  %v1350_v18 = vadd.f32 %v2232_v61, %v1076_v35  ;;  %v1295_v16 = vpop.f32.mrb[27].mxu1 }
 0x2e3   : > { %v1634_v43 = vmul.f32 %v3621_v41, %v1410_v32  ;;  %v1413_v44 = vld [vmem:[#allocation2 + $0xb8] sm:$0xff]  ;;  %1379 = vst.msk [vmem:[#allocation2 + $0xc0] sm:$0xff] %vm374_vm0, %v1347_v27  ;;  %v1348_v45 = vadd.f32 %v1295_v16, %v1074_v2 }
 0x2e4   : > { %v2112_v50 = vpack.c.bf16 %v1636_v33, %v1636_v33  ;;  %v1637_v52 = vmul.f32 %v1572_v62, %v1413_v44  ;;  %v1411_v8 = vld [vmem:[#allocation2 + $0xa8] sm:$0xff]  ;;  %1382 = vst.msk [vmem:[#allocation2 + $0xd8] sm:$0xff] %vm374_vm0, %v1350_v18 }
 0x2e5   : > { %v2110_v13 = vpack.c.bf16 %v1634_v43, %v1634_v43  ;;  %v1635_v51 = vmul.f32 %v3627_v47, %v1411_v8  ;;  %1380 = vst.msk [vmem:[#allocation2 + $0xc8] sm:$0xff] %vm374_vm0, %v1348_v45  ;;  %v1602_v39 = vpop.permute.xlu1 %1601 }
 0x2e6   : > { %1797 = vst.msk [vmem:[%s3566_s20 + $0x58] sm:$0xf] %vm1774_vm2, %v2112_v50  ;;  %v2113_v41 = vpack.c.bf16 %v1637_v52, %v1637_v52 }
 0x2e7   : > { %1795 = vst.msk [vmem:[%s3566_s20 + $0x50] sm:$0xf] %vm1774_vm2, %v2110_v13  ;;  %v2111_v57 = vpack.c.bf16 %v1635_v51, %v1635_v51  ;;  %v2235_v60 = vpop.f32.mrb[28].mxu1 }
 0x2e8   : > { %1798 = vst.msk [vmem:[%s3566_s20 + $0x5c] sm:$0xf] %vm1774_vm2, %v2113_v41  ;;  %v1353_v59 = vadd.f32 %v2235_v60, %v1079_v34  ;;  %v1308_v1 = vpop.f32.mrb[29].mxu1 }
 0x2e9   : > { %1796 = vst.msk [vmem:[%s3566_s20 + $0x54] sm:$0xf] %vm1774_vm2, %v2111_v57  ;;  %v1416_v47 = vld [vmem:[#allocation2 + $0xd0] sm:$0xff]  ;;  %v1351_v20 = vadd.f32 %v1308_v1, %v1077_v22  ;;  %v2236_v0 = vpop.f32.mrb[30].mxu1  ;;  %v1612_v38 = vpop.permute.xlu1 %1611 }
 0x2ea   : > { %v1640_v3 = vmul.f32 %v1587_v55, %v1416_v47  ;;  %v1414_v58 = vld [vmem:[#allocation2 + $0xc0] sm:$0xff]  ;;  %1385 = vst.msk [vmem:[#allocation2 + $0xf0] sm:$0xff] %vm374_vm0, %v1353_v59  ;;  %v1354_v4 = vadd.f32 %v2236_v0, %v1080_v40  ;;  %v1311_v53 = vpop.f32.mrb[31].mxu1 }
 0x2eb   : > { %v1638_v7 = vmul.f32 %v1577_v46, %v1414_v58  ;;  %v1417_v9 = vld [vmem:[#allocation2 + $0xd8] sm:$0xff]  ;;  %1383 = vst.msk [vmem:[#allocation2 + $0xe0] sm:$0xff] %vm374_vm0, %v1351_v20  ;;  %v1352_v49 = vadd.f32 %v1311_v53, %v1078_v54 }
 0x2ec   : > { %v2116_v48 = vpack.c.bf16 %v1640_v3, %v1640_v3  ;;  %v1641_v28 = vmul.f32 %v1592_v30, %v1417_v9  ;;  %v1415_v63 = vld [vmem:[#allocation2 + $0xc8] sm:$0xff]  ;;  %1386 = vst.msk [vmem:[#allocation2 + $0xf8] sm:$0xff] %vm374_vm0, %v1354_v4 }
 0x2ed   : > { %v2114_v10 = vpack.c.bf16 %v1638_v7, %v1638_v7  ;;  %v1639_v15 = vmul.f32 %v1582_v26, %v1415_v63  ;;  %1384 = vst.msk [vmem:[#allocation2 + $0xe8] sm:$0xff] %vm374_vm0, %v1352_v49 }
 0x2ee   : > { %1801 = vst.msk [vmem:[%s3566_s20 + $0x68] sm:$0xf] %vm1774_vm2, %v2116_v48  ;;  %v2117_v14 = vpack.c.bf16 %v1641_v28, %v1641_v28 }
 0x2ef   : > { %1799 = vst.msk [vmem:[%s3566_s20 + $0x60] sm:$0xf] %vm1774_vm2, %v2114_v10  ;;  %v2115_v62 = vpack.c.bf16 %v1639_v15, %v1639_v15 }
 0x2f0   : > { %1802 = vst.msk [vmem:[%s3566_s20 + $0x6c] sm:$0xf] %vm1774_vm2, %v2117_v14 }
 0x2f1   : > { %1800 = vst.msk [vmem:[%s3566_s20 + $0x64] sm:$0xf] %vm1774_vm2, %v2115_v62  ;;  %v1420_v19 = vld [vmem:[#allocation2 + $0xf0] sm:$0xff] }
 0x2f2   : > { %v1644_v23 = vmul.f32 %v1607_v17, %v1420_v19  ;;  %v1418_v25 = vld [vmem:[#allocation2 + $0xe0] sm:$0xff] }
 0x2f3   : > { %v1642_v42 = vmul.f32 %v1597_v5, %v1418_v25  ;;  %v1421_v29 = vld [vmem:[#allocation2 + $0xf8] sm:$0xff] }
 0x2f4   : > { %v2120_v21 = vpack.c.bf16 %v1644_v23, %v1644_v23  ;;  %v1645_v31 = vmul.f32 %v1612_v38, %v1421_v29  ;;  %v1419_v6 = vld [vmem:[#allocation2 + $0xe8] sm:$0xff] }
 0x2f5   : > { %v2118_v37 = vpack.c.bf16 %v1642_v42, %v1642_v42  ;;  %v1643_v46 = vmul.f32 %v1602_v39, %v1419_v6 }
 0x2f6   : > { %1805 = vst.msk [vmem:[%s3566_s20 + $0x78] sm:$0xf] %vm1774_vm2, %v2120_v21  ;;  %v2121_v24 = vpack.c.bf16 %v1645_v31, %v1645_v31 }
 0x2f7   : > { %1803 = vst.msk [vmem:[%s3566_s20 + $0x70] sm:$0xf] %vm1774_vm2, %v2118_v37  ;;  %v2119_v56 = vpack.c.bf16 %v1643_v46, %v1643_v46 }
 0x2f8   : > { %1806 = vst.msk [vmem:[%s3566_s20 + $0x7c] sm:$0xf] %vm1774_vm2, %v2121_v24 }
 0x2f9   : > { %1804 = vst.msk [vmem:[%s3566_s20 + $0x74] sm:$0xf] %vm1774_vm2, %v2119_v56 }
 0x2fa   : > { %2610 = shalt.err (!%p2607_p10)
}
 0x2fb   : > { %s2611_s11 = scalar_lea.hbm %s3686_s1, 2048  ;;  %s2615_s19 = scalar_lea.hbm %s3833_s27, 10240 }
 0x2fc   : > { %p2612_p8 = scmp.ne.s32.totalorder %s3686_s1, %s2611_s11  ;;  %p2616_p13 = scmp.lt.u32.totalorder %s3686_s1, %s3833_s27 }
 0x2fd   : > { %p2617_p9 = scmp.lt.u32.totalorder %s2615_s19, %s2611_s11  ;;  %p2619_p0 = scmp.lt.u32.totalorder %s2611_s11, %s3686_s1 }
 0x2fe   : > { %p2613_p3 = pnand %p2612_p8, %p3834_p2 }
 0x2ff   : > { %p2618_p7 = por %p2617_p9, %p2616_p13 }
 0x300   : > { %p2614_p5 = pneg %p2613_p3 }
 0x301   : > { %p2620_p6 = por %p2619_p0, %p2618_p7 }
 0x303   : > { %p2621_p12 = pnand %p2620_p6, %p2614_p5 }
 0x305   : > { %2624 = shalt.err (!%p2621_p12)
}
 0x306   : > { %s2755_s2 = smov 64   ;;  %s2756_s20 = smov 4  }
 0x307   : > { %2249 = dma.vmem_to_hbm [thread:$0]  (%p3834_p2), %s3688_s15, 2048, %s3686_s1, %s1808_s6, %s2755_s2, %s2755_s2, %s2756_s20  }
 0x308 PF: > { %s3835_s18 = sld [smem:[#allocation26_spill]]  ;;  %s3836_s22 = sld [smem:[#allocation33_spill]] }
 0x309   : > { %p2273_p11 = scmp.ge.s32.totalorder %s2741_s13, 2 }
 0x30e   : > { %s1836_s5 = sand.u32 1, %s3835_s18   ;;  %p3837_p4 = scmp.ne.s32.totalorder %s3836_s22, 0 }
 0x30f   : > { %s1837_s24 = scalar_lea.sflag [#allocation7], %s1836_s5 }
 0x310   : > { %p2269_p1 = pnand %p2273_p11, %p3837_p4 }
 0x312   : > { %2692 = dma.done.wait (!%p2269_p1), %s1837_s24, 2048  }
 0x313   : > { %2694 = vsyncadd (!%p2269_p1), %s1837_s24, 4294965248  ;;  %s31_s13 = sadd.s32 1, %s2741_s13   ;;  %s3838_s28 = sld [smem:[#allocation24_spill]] }
 0x314   : > { %p28_p10 = scmp.ge.s32.totalorder %s31_s13, 7   ;;  %s3839_s21 = sld [smem:[#allocation25_spill]] }
 0x315   : > { %s3840_s7 = sld [smem:[#allocation30_spill]]  ;;  %s3841_s15 = sld [smem:[#allocation27_spill]] }
 0x316   : > { %s3842_s10 = sld [smem:[#allocation31_spill]]  ;;  %s3843_s1 = sld [smem:[#allocation29_spill]] }
 0x317   : > { %s3844_s29 = smov %s2705_s30  ;;  %s3845_s30 = smov %s3055_s16 }
 0x318   : > { %s3846_s6 = smov %s2713_s0  ;;  %s3848_s8 = smov %s2725_s9 }
 0x319   : > { %s3850_s11 = smov %s2737_s12  ;;  %30 = sbr.rel (!%p28_p10) target bundleno = 26 (0x1a), region = 126 }
 0x31a   : > { %s3847_s0 = smov %s3839_s21 }
 0x31b   : > { %s3849_s9 = smov %s3841_s15 }
 0x31c   : > { %s3851_s12 = smov %s3843_s1 }
 0x320   :  { %1842 = vsyncpa [#allocation6], 1 }
 0x321   :  { %1844 = vsyncpa [#allocation6 + $0x1], 1 }
 0x322   :  { %1845 = vsyncpa [#allocation9], 1 }
 0x323   :  { %1847 = vsyncpa [#allocation9 + $0x1], 1 }
 0x324   :  { %1848 = vsyncpa [#allocation12], 1 }
 0x325   :  { %1850 = vsyncpa [#allocation12 + $0x1], 1 }
 0x326   :  { %1851 = vsyncpa [#allocation7], 1 }
 0x327   :  { %1853 = vsyncpa [#allocation7 + $0x1], 1 }

</bundles_post_ra>
